<compile_context>
chip_gen: v7x
topology: tpu7x:2x2x1
jax: 0.10.0
libtpu: 0.0.40
codegen_flags: <defaults>
</compile_context>

<pallas_src>
import functools

import jax
import jax.numpy as jnp
import numpy as np
from jax.experimental import pallas as pl
from jax.experimental.pallas import tpu as pltpu

EPS = 1e-5  # nn.InstanceNorm2d default


# ---------------------------------------------------------------------------
# Fused Pallas kernel: all ResBlocks for one sample
# ---------------------------------------------------------------------------
def resblocks_kernel(x_ref, w_ref, b_ref, m_ref, o_ref, buf,
                     *, num_blocks, C, H, W):
    """x_ref:(1,C,P) zero-padded+flattened sample, w_ref:(nb*2*9,C,C),
    b_ref:(nb*2,C,1), m_ref:(1,span) validity mask, o_ref:(1,C,P),
    buf: (C,P) f32 VMEM scratch holding the padded activation."""
    Wp = W + 2
    P = (H + 2) * Wp
    span = (H - 1) * Wp + W          # contiguous range covering all valid pixels
    off = Wp + 1                     # flat-padded index of pixel (0, 0)
    inv_n = 1.0 / float(H * W)

    # Padded activation (pad positions are exact zeros and stay zero throughout).
    buf[...] = x_ref[0].astype(jnp.float32)
    validf = m_ref[...]              # (1, span) f32: 1 at real pixels, 0 at pad cols

    def conv_in(blk, ci):
        """3x3 'same' conv (+bias) followed by InstanceNorm(affine=False)."""
        acc = None
        for kh in range(3):
            for kw in range(3):
                d = kh * Wp + kw                      # static tap shift
                xt = buf[:, pl.ds(d, span)]           # (C_in, span), zero-padded taps
                wt = w_ref[(blk * 2 + ci) * 9 + kh * 3 + kw]   # (C_out, C_in)
                p = jnp.dot(wt.astype(jnp.float32), xt,
                            preferred_element_type=jnp.float32)
                acc = p if acc is None else acc + p
        y = acc + b_ref[blk * 2 + ci].astype(jnp.float32)      # (C, span) + (C, 1)
        # single-pass IN statistics over the H*W valid positions only
        ym = y * validf
        s1 = jnp.sum(ym, axis=1, keepdims=True)                # (C, 1)
        s2 = jnp.sum(ym * ym, axis=1, keepdims=True)           # (C, 1)
        mean = s1 * inv_n
        var = jnp.maximum(s2 * inv_n - mean * mean, 0.0)
        return (y - mean) * jax.lax.rsqrt(var + EPS)

    for blk in range(num_blocks):
        residual = buf[:, pl.ds(off, span)]                    # pre-block activation
        h = jnp.maximum(conv_in(blk, 0), 0.0)                  # conv -> IN -> ReLU
        buf[:, pl.ds(off, span)] = h * validf                  # keep pad cols zero
        y = conv_in(blk, 1) + residual                         # conv -> IN -> +skip
        buf[:, pl.ds(off, span)] = y * validf

    o_ref[0] = buf[...].astype(o_ref.dtype)


# ---------------------------------------------------------------------------
# Wrapper
# ---------------------------------------------------------------------------
def res_blocks_forward(x_nchw, w_all, b_all):
    """x: (B, C, H, W).  w_all: (nb*2*9, C, C) with w[(blk*2+conv)*9 + kh*3+kw] =
    W_oihw[:, :, kh, kw].  b_all: (nb*2, C, 1)."""
    B, C, H, W = x_nchw.shape
    nb = w_all.shape[0] // 18
    Hp, Wp = H + 2, W + 2
    P = Hp * Wp
    span = (H - 1) * Wp + W
    off = Wp + 1

    # One-time layout glue at the boundary: zero-pad + flatten spatial dims.
    xp = jnp.pad(x_nchw, ((0, 0), (0, 0), (1, 1), (1, 1))).reshape(B, C, P)

    # Validity mask over the computed span (excludes the padding columns).
    m = np.zeros((Hp, Wp), np.float32)
    m[1:H + 1, 1:W + 1] = 1.0
    mask = jnp.asarray(m.reshape(-1)[off:off + span].reshape(1, span))

    kern = functools.partial(resblocks_kernel, num_blocks=nb, C=C, H=H, W=W)

    out_p = pl.pallas_call(
        kern,
        out_shape=jax.ShapeDtypeStruct((B, C, P), x_nchw.dtype),
        grid_spec=pltpu.PrefetchScalarGridSpec(
            num_scalar_prefetch=0,
            grid=(B,),
            in_specs=[
                pl.BlockSpec((1, C, P), lambda b: (b, 0, 0)),          # x (per sample)
                pl.BlockSpec((nb * 2 * 9, C, C), lambda b: (0, 0, 0)),  # weights (resident)
                pl.BlockSpec((nb * 2, C, 1), lambda b: (0, 0, 0)),      # biases (resident)
                pl.BlockSpec((1, span), lambda b: (0, 0)),              # mask (resident)
            ],
            out_specs=pl.BlockSpec((1, C, P), lambda b: (b, 0, 0)),
            scratch_shapes=[pltpu.VMEM((C, P), jnp.float32)],
        ),
        compiler_params=pltpu.CompilerParams(dimension_semantics=("parallel",)),
    )(xp, w_all, b_all, mask)

    # Drop the spatial padding (tiny XLA slice at the network boundary).
    return out_p.reshape(B, C, Hp, Wp)[:, :, 1:-1, 1:-1]


def pack_params(params):
    """params: list of (w1, b1, w2, b2) with w in OIHW -> kernel format."""
    w_list, b_list = [], []
    for (w1, b1, w2, b2) in params:
        for w, b in ((w1, b1), (w2, b2)):
            C = w.shape[0]
            w_list.append(jnp.transpose(w, (2, 3, 0, 1)).reshape(9, C, C))
            b_list.append(b.reshape(C, 1))
    return jnp.concatenate(w_list, axis=0), jnp.stack(b_list, axis=0)


# ---------------------------------------------------------------------------
# Pure-JAX reference (for correctness check)
# ---------------------------------------------------------------------------
def _ref_conv_in(x, w_oihw, b, relu):
    y = jax.lax.conv_general_dilated(
        x, w_oihw, window_strides=(1, 1), padding=((1, 1), (1, 1)),
        dimension_numbers=("NCHW", "OIHW", "NCHW"))
    y = y + b.reshape(1, -1, 1, 1)
    mean = y.mean(axis=(2, 3), keepdims=True)
    var = ((y - mean) ** 2).mean(axis=(2, 3), keepdims=True)
    y = (y - mean) / jnp.sqrt(var + EPS)
    if relu:
        y = jnp.maximum(y, 0.0)
    return y


def res_blocks_reference(x, params):
    for (w1, b1, w2, b2) in params:
        residual = x
        h = _ref_conv_in(x, w1, b1, relu=True)
        x = _ref_conv_in(h, w2, b2, relu=False) + residual
    return x


# ---------------------------------------------------------------------------
if __name__ == "__main__":
    # ResBlocks(num_blocks=2, dim=8, norm='in', activation='relu',
    #           pad_type='zero', res_type='basic')
    num_blocks, dim, B, H, W = 2, 8, 2, 16, 16

    key = jax.random.PRNGKey(0)
    key, xk = jax.random.split(key)
    x = jax.random.normal(xk, (B, dim, H, W), dtype=jnp.float32)  # NCHW input

    params = []
    for _ in range(num_blocks):
        key, k1, k2, k3, k4 = jax.random.split(key, 5)
        w1 = 0.1 * jax.random.normal(k1, (dim, dim, 3, 3), dtype=jnp.float32)  # OIHW
        b1 = 0.1 * jax.random.normal(k2, (dim,), dtype=jnp.float32)
        w2 = 0.1 * jax.random.normal(k3, (dim, dim, 3, 3), dtype=jnp.float32)
        b2 = 0.1 * jax.random.normal(k4, (dim,), dtype=jnp.float32)
        params.append((w1, b1, w2, b2))

    w_all, b_all = pack_params(params)

    out = jax.block_until_ready(res_blocks_forward(x, w_all, b_all))
    ref = jax.block_until_ready(res_blocks_reference(x, params))

    max_err = float(jnp.max(jnp.abs(out - ref)))
    assert out.shape == (B, dim, H, W), out.shape
    assert max_err < 2e-3, f"max abs error {max_err}"

    print("KERNEL_OK")
</pallas_src>

<mosaic_0001>
module attributes {stable_mosaic.version = 11 : i64} {
  func.func @resblocks_kernel(%arg0: i32, %arg1: memref<1x8x324xf32, #tpu.memory_space<vmem>>, %arg2: memref<36x8x8xf32, #tpu.memory_space<vmem>>, %arg3: memref<4x8x1xf32, #tpu.memory_space<vmem>>, %arg4: memref<1x286xf32, #tpu.memory_space<vmem>>, %arg5: memref<1x8x324xf32, #tpu.memory_space<vmem>>, %arg6: memref<8x324xf32, #tpu.memory_space<vmem>>) attributes {dimension_semantics = [#tpu.dimension_semantics<parallel>], iteration_bounds = array<i64: 2>, scalar_prefetch = 0 : i64, scratch_operands = 1 : i64, tpu.core_type = #tpu.core_type<tc>, window_params = [{transform_indices = @transform_0, window_bounds = array<i64: 1, 8, 324>}, {pipeline_mode = #tpu.pipeline_mode<synchronous>, transform_indices = @transform_1, window_bounds = array<i64: 36, 8, 8>}, {pipeline_mode = #tpu.pipeline_mode<synchronous>, transform_indices = @transform_2, window_bounds = array<i64: 4, 8, 1>}, {pipeline_mode = #tpu.pipeline_mode<synchronous>, transform_indices = @transform_3, window_bounds = array<i64: 1, 286>}, {transform_indices = @transform_4, window_bounds = array<i64: 1, 8, 324>}]} {
    %c0 = arith.constant 0 : index
    %c0_0 = arith.constant 0 : index
    %c0_1 = arith.constant 0 : index
    %0 = vector.load %arg1[%c0, %c0_0, %c0_1] : memref<1x8x324xf32, #tpu.memory_space<vmem>>, vector<1x8x324xf32>
    %1 = vector.shape_cast %0 : vector<1x8x324xf32> to vector<8x324xf32>
    %c0_2 = arith.constant 0 : index
    %c0_3 = arith.constant 0 : index
    %2 = vector.load %arg6[%c0_2, %c0_3] : memref<8x324xf32, #tpu.memory_space<vmem>>, vector<8x324xf32>
    tpu.vector_store %arg6[%c0_2, %c0_3], %1 {strides = array<i32>} : memref<8x324xf32, #tpu.memory_space<vmem>>, vector<8x324xf32>,
    %c0_4 = arith.constant 0 : index
    %c0_5 = arith.constant 0 : index
    %3 = vector.load %arg4[%c0_4, %c0_5] : memref<1x286xf32, #tpu.memory_space<vmem>>, vector<1x286xf32>
    %c0_6 = arith.constant 0 : index
    %c19 = arith.constant 19 : index
    %4 = vector.load %arg6[%c0_6, %c19] : memref<8x324xf32, #tpu.memory_space<vmem>>, vector<8x286xf32>
    %c0_7 = arith.constant 0 : index
    %c0_8 = arith.constant 0 : index
    %5 = vector.load %arg6[%c0_7, %c0_8] : memref<8x324xf32, #tpu.memory_space<vmem>>, vector<8x286xf32>
    %c0_9 = arith.constant 0 : index
    %c0_10 = arith.constant 0 : index
    %c0_11 = arith.constant 0 : index
    %6 = vector.load %arg2[%c0_9, %c0_10, %c0_11] : memref<36x8x8xf32, #tpu.memory_space<vmem>>, vector<1x8x8xf32>
    %7 = vector.shape_cast %6 : vector<1x8x8xf32> to vector<8x8xf32>
    %cst = arith.constant dense<0.000000e+00> : vector<8x286xf32>
    %8 = tpu.matmul %7, %5, %cst {dimension_numbers = #tpu.dot_dimension_numbers<[1], [0], [0], [1], [0, 0, 1, 1], [], []>} : vector<8x8xf32>, vector<8x286xf32>, vector<8x286xf32> -> vector<8x286xf32>
    %c0_12 = arith.constant 0 : index
    %c1 = arith.constant 1 : index
    %9 = vector.load %arg6[%c0_12, %c1] : memref<8x324xf32, #tpu.memory_space<vmem>>, vector<8x286xf32>
    %c1_13 = arith.constant 1 : index
    %c0_14 = arith.constant 0 : index
    %c0_15 = arith.constant 0 : index
    %10 = vector.load %arg2[%c1_13, %c0_14, %c0_15] : memref<36x8x8xf32, #tpu.memory_space<vmem>>, vector<1x8x8xf32>
    %11 = vector.shape_cast %10 : vector<1x8x8xf32> to vector<8x8xf32>
    %cst_16 = arith.constant dense<0.000000e+00> : vector<8x286xf32>
    %12 = tpu.matmul %11, %9, %cst_16 {dimension_numbers = #tpu.dot_dimension_numbers<[1], [0], [0], [1], [0, 0, 1, 1], [], []>} : vector<8x8xf32>, vector<8x286xf32>, vector<8x286xf32> -> vector<8x286xf32>
    %13 = arith.addf %8, %12 : vector<8x286xf32>
    %c0_17 = arith.constant 0 : index
    %c2 = arith.constant 2 : index
    %14 = vector.load %arg6[%c0_17, %c2] : memref<8x324xf32, #tpu.memory_space<vmem>>, vector<8x286xf32>
    %c2_18 = arith.constant 2 : index
    %c0_19 = arith.constant 0 : index
    %c0_20 = arith.constant 0 : index
    %15 = vector.load %arg2[%c2_18, %c0_19, %c0_20] : memref<36x8x8xf32, #tpu.memory_space<vmem>>, vector<1x8x8xf32>
    %16 = vector.shape_cast %15 : vector<1x8x8xf32> to vector<8x8xf32>
    %cst_21 = arith.constant dense<0.000000e+00> : vector<8x286xf32>
    %17 = tpu.matmul %16, %14, %cst_21 {dimension_numbers = #tpu.dot_dimension_numbers<[1], [0], [0], [1], [0, 0, 1, 1], [], []>} : vector<8x8xf32>, vector<8x286xf32>, vector<8x286xf32> -> vector<8x286xf32>
    %18 = arith.addf %13, %17 : vector<8x286xf32>
    %c0_22 = arith.constant 0 : index
    %c18 = arith.constant 18 : index
    %19 = vector.load %arg6[%c0_22, %c18] : memref<8x324xf32, #tpu.memory_space<vmem>>, vector<8x286xf32>
    %c3 = arith.constant 3 : index
    %c0_23 = arith.constant 0 : index
    %c0_24 = arith.constant 0 : index
    %20 = vector.load %arg2[%c3, %c0_23, %c0_24] : memref<36x8x8xf32, #tpu.memory_space<vmem>>, vector<1x8x8xf32>
    %21 = vector.shape_cast %20 : vector<1x8x8xf32> to vector<8x8xf32>
    %cst_25 = arith.constant dense<0.000000e+00> : vector<8x286xf32>
    %22 = tpu.matmul %21, %19, %cst_25 {dimension_numbers = #tpu.dot_dimension_numbers<[1], [0], [0], [1], [0, 0, 1, 1], [], []>} : vector<8x8xf32>, vector<8x286xf32>, vector<8x286xf32> -> vector<8x286xf32>
    %23 = arith.addf %18, %22 : vector<8x286xf32>
    %c0_26 = arith.constant 0 : index
    %c19_27 = arith.constant 19 : index
    %24 = vector.load %arg6[%c0_26, %c19_27] : memref<8x324xf32, #tpu.memory_space<vmem>>, vector<8x286xf32>
    %c4 = arith.constant 4 : index
    %c0_28 = arith.constant 0 : index
    %c0_29 = arith.constant 0 : index
    %25 = vector.load %arg2[%c4, %c0_28, %c0_29] : memref<36x8x8xf32, #tpu.memory_space<vmem>>, vector<1x8x8xf32>
    %26 = vector.shape_cast %25 : vector<1x8x8xf32> to vector<8x8xf32>
    %cst_30 = arith.constant dense<0.000000e+00> : vector<8x286xf32>
    %27 = tpu.matmul %26, %24, %cst_30 {dimension_numbers = #tpu.dot_dimension_numbers<[1], [0], [0], [1], [0, 0, 1, 1], [], []>} : vector<8x8xf32>, vector<8x286xf32>, vector<8x286xf32> -> vector<8x286xf32>
    %28 = arith.addf %23, %27 : vector<8x286xf32>
    %c0_31 = arith.constant 0 : index
    %c20 = arith.constant 20 : index
    %29 = vector.load %arg6[%c0_31, %c20] : memref<8x324xf32, #tpu.memory_space<vmem>>, vector<8x286xf32>
    %c5 = arith.constant 5 : index
    %c0_32 = arith.constant 0 : index
    %c0_33 = arith.constant 0 : index
    %30 = vector.load %arg2[%c5, %c0_32, %c0_33] : memref<36x8x8xf32, #tpu.memory_space<vmem>>, vector<1x8x8xf32>
    %31 = vector.shape_cast %30 : vector<1x8x8xf32> to vector<8x8xf32>
    %cst_34 = arith.constant dense<0.000000e+00> : vector<8x286xf32>
    %32 = tpu.matmul %31, %29, %cst_34 {dimension_numbers = #tpu.dot_dimension_numbers<[1], [0], [0], [1], [0, 0, 1, 1], [], []>} : vector<8x8xf32>, vector<8x286xf32>, vector<8x286xf32> -> vector<8x286xf32>
    %33 = arith.addf %28, %32 : vector<8x286xf32>
    %c0_35 = arith.constant 0 : index
    %c36 = arith.constant 36 : index
    %34 = vector.load %arg6[%c0_35, %c36] : memref<8x324xf32, #tpu.memory_space<vmem>>, vector<8x286xf32>
    %c6 = arith.constant 6 : index
    %c0_36 = arith.constant 0 : index
    %c0_37 = arith.constant 0 : index
    %35 = vector.load %arg2[%c6, %c0_36, %c0_37] : memref<36x8x8xf32, #tpu.memory_space<vmem>>, vector<1x8x8xf32>
    %36 = vector.shape_cast %35 : vector<1x8x8xf32> to vector<8x8xf32>
    %cst_38 = arith.constant dense<0.000000e+00> : vector<8x286xf32>
    %37 = tpu.matmul %36, %34, %cst_38 {dimension_numbers = #tpu.dot_dimension_numbers<[1], [0], [0], [1], [0, 0, 1, 1], [], []>} : vector<8x8xf32>, vector<8x286xf32>, vector<8x286xf32> -> vector<8x286xf32>
    %38 = arith.addf %33, %37 : vector<8x286xf32>
    %c0_39 = arith.constant 0 : index
    %c37 = arith.constant 37 : index
    %39 = vector.load %arg6[%c0_39, %c37] : memref<8x324xf32, #tpu.memory_space<vmem>>, vector<8x286xf32>
    %c7 = arith.constant 7 : index
    %c0_40 = arith.constant 0 : index
    %c0_41 = arith.constant 0 : index
    %40 = vector.load %arg2[%c7, %c0_40, %c0_41] : memref<36x8x8xf32, #tpu.memory_space<vmem>>, vector<1x8x8xf32>
    %41 = vector.shape_cast %40 : vector<1x8x8xf32> to vector<8x8xf32>
    %cst_42 = arith.constant dense<0.000000e+00> : vector<8x286xf32>
    %42 = tpu.matmul %41, %39, %cst_42 {dimension_numbers = #tpu.dot_dimension_numbers<[1], [0], [0], [1], [0, 0, 1, 1], [], []>} : vector<8x8xf32>, vector<8x286xf32>, vector<8x286xf32> -> vector<8x286xf32>
    %43 = arith.addf %38, %42 : vector<8x286xf32>
    %c0_43 = arith.constant 0 : index
    %c38 = arith.constant 38 : index
    %44 = vector.load %arg6[%c0_43, %c38] : memref<8x324xf32, #tpu.memory_space<vmem>>, vector<8x286xf32>
    %c8 = arith.constant 8 : index
    %c0_44 = arith.constant 0 : index
    %c0_45 = arith.constant 0 : index
    %45 = vector.load %arg2[%c8, %c0_44, %c0_45] : memref<36x8x8xf32, #tpu.memory_space<vmem>>, vector<1x8x8xf32>
    %46 = vector.shape_cast %45 : vector<1x8x8xf32> to vector<8x8xf32>
    %cst_46 = arith.constant dense<0.000000e+00> : vector<8x286xf32>
    %47 = tpu.matmul %46, %44, %cst_46 {dimension_numbers = #tpu.dot_dimension_numbers<[1], [0], [0], [1], [0, 0, 1, 1], [], []>} : vector<8x8xf32>, vector<8x286xf32>, vector<8x286xf32> -> vector<8x286xf32>
    %48 = arith.addf %43, %47 : vector<8x286xf32>
    %c0_47 = arith.constant 0 : index
    %c0_48 = arith.constant 0 : index
    %c0_49 = arith.constant 0 : index
    %49 = vector.load %arg3[%c0_47, %c0_48, %c0_49] : memref<4x8x1xf32, #tpu.memory_space<vmem>>, vector<1x8x1xf32>
    %50 = vector.shape_cast %49 : vector<1x8x1xf32> to vector<8x1xf32>
    %51 = vector.broadcast %50 : vector<8x1xf32> to vector<8x286xf32>
    %52 = arith.addf %48, %51 : vector<8x286xf32>
    %53 = vector.broadcast %3 : vector<1x286xf32> to vector<8x286xf32>
    %54 = arith.mulf %52, %53 : vector<8x286xf32>
    %cst_50 = arith.constant dense<0.000000e+00> : vector<8xf32>
    %55 = vector.multi_reduction <add>, %54, %cst_50 [1] : vector<8x286xf32> to vector<8xf32>
    %56 = vector.shape_cast %55 : vector<8xf32> to vector<8x1xf32>
    %57 = arith.mulf %54, %54 : vector<8x286xf32>
    %cst_51 = arith.constant dense<0.000000e+00> : vector<8xf32>
    %58 = vector.multi_reduction <add>, %57, %cst_51 [1] : vector<8x286xf32> to vector<8xf32>
    %59 = vector.shape_cast %58 : vector<8xf32> to vector<8x1xf32>
    %cst_52 = arith.constant 3.906250e-03 : f32
    %60 = vector.broadcast %cst_52 : f32 to vector<8x1xf32>
    %61 = arith.mulf %56, %60 : vector<8x1xf32>
    %cst_53 = arith.constant 3.906250e-03 : f32
    %62 = vector.broadcast %cst_53 : f32 to vector<8x1xf32>
    %63 = arith.mulf %59, %62 : vector<8x1xf32>
    %64 = arith.mulf %61, %61 : vector<8x1xf32>
    %65 = arith.subf %63, %64 : vector<8x1xf32>
    %cst_54 = arith.constant 0.000000e+00 : f32
    %66 = vector.broadcast %cst_54 : f32 to vector<8x1xf32>
    %67 = arith.maximumf %65, %66 : vector<8x1xf32>
    %68 = vector.broadcast %61 : vector<8x1xf32> to vector<8x286xf32>
    %69 = arith.subf %52, %68 : vector<8x286xf32>
    %cst_55 = arith.constant 9.99999974E-6 : f32
    %70 = vector.broadcast %cst_55 : f32 to vector<8x1xf32>
    %71 = arith.addf %67, %70 : vector<8x1xf32>
    %72 = math.rsqrt %71 : vector<8x1xf32>
    %73 = vector.broadcast %72 : vector<8x1xf32> to vector<8x286xf32>
    %74 = arith.mulf %69, %73 : vector<8x286xf32>
    %cst_56 = arith.constant 0.000000e+00 : f32
    %75 = vector.broadcast %cst_56 : f32 to vector<8x286xf32>
    %76 = arith.maximumf %74, %75 : vector<8x286xf32>
    %77 = vector.broadcast %3 : vector<1x286xf32> to vector<8x286xf32>
    %78 = arith.mulf %76, %77 : vector<8x286xf32>
    %c0_57 = arith.constant 0 : index
    %c19_58 = arith.constant 19 : index
    %79 = vector.load %arg6[%c0_57, %c19_58] : memref<8x324xf32, #tpu.memory_space<vmem>>, vector<8x286xf32>
    tpu.vector_store %arg6[%c0_57, %c19_58], %78 {strides = array<i32>} : memref<8x324xf32, #tpu.memory_space<vmem>>, vector<8x286xf32>,
    %c0_59 = arith.constant 0 : index
    %c0_60 = arith.constant 0 : index
    %80 = vector.load %arg6[%c0_59, %c0_60] : memref<8x324xf32, #tpu.memory_space<vmem>>, vector<8x286xf32>
    %c9 = arith.constant 9 : index
    %c0_61 = arith.constant 0 : index
    %c0_62 = arith.constant 0 : index
    %81 = vector.load %arg2[%c9, %c0_61, %c0_62] : memref<36x8x8xf32, #tpu.memory_space<vmem>>, vector<1x8x8xf32>
    %82 = vector.shape_cast %81 : vector<1x8x8xf32> to vector<8x8xf32>
    %cst_63 = arith.constant dense<0.000000e+00> : vector<8x286xf32>
    %83 = tpu.matmul %82, %80, %cst_63 {dimension_numbers = #tpu.dot_dimension_numbers<[1], [0], [0], [1], [0, 0, 1, 1], [], []>} : vector<8x8xf32>, vector<8x286xf32>, vector<8x286xf32> -> vector<8x286xf32>
    %c0_64 = arith.constant 0 : index
    %c1_65 = arith.constant 1 : index
    %84 = vector.load %arg6[%c0_64, %c1_65] : memref<8x324xf32, #tpu.memory_space<vmem>>, vector<8x286xf32>
    %c10 = arith.constant 10 : index
    %c0_66 = arith.constant 0 : index
    %c0_67 = arith.constant 0 : index
    %85 = vector.load %arg2[%c10, %c0_66, %c0_67] : memref<36x8x8xf32, #tpu.memory_space<vmem>>, vector<1x8x8xf32>
    %86 = vector.shape_cast %85 : vector<1x8x8xf32> to vector<8x8xf32>
    %cst_68 = arith.constant dense<0.000000e+00> : vector<8x286xf32>
    %87 = tpu.matmul %86, %84, %cst_68 {dimension_numbers = #tpu.dot_dimension_numbers<[1], [0], [0], [1], [0, 0, 1, 1], [], []>} : vector<8x8xf32>, vector<8x286xf32>, vector<8x286xf32> -> vector<8x286xf32>
    %88 = arith.addf %83, %87 : vector<8x286xf32>
    %c0_69 = arith.constant 0 : index
    %c2_70 = arith.constant 2 : index
    %89 = vector.load %arg6[%c0_69, %c2_70] : memref<8x324xf32, #tpu.memory_space<vmem>>, vector<8x286xf32>
    %c11 = arith.constant 11 : index
    %c0_71 = arith.constant 0 : index
    %c0_72 = arith.constant 0 : index
    %90 = vector.load %arg2[%c11, %c0_71, %c0_72] : memref<36x8x8xf32, #tpu.memory_space<vmem>>, vector<1x8x8xf32>
    %91 = vector.shape_cast %90 : vector<1x8x8xf32> to vector<8x8xf32>
    %cst_73 = arith.constant dense<0.000000e+00> : vector<8x286xf32>
    %92 = tpu.matmul %91, %89, %cst_73 {dimension_numbers = #tpu.dot_dimension_numbers<[1], [0], [0], [1], [0, 0, 1, 1], [], []>} : vector<8x8xf32>, vector<8x286xf32>, vector<8x286xf32> -> vector<8x286xf32>
    %93 = arith.addf %88, %92 : vector<8x286xf32>
    %c0_74 = arith.constant 0 : index
    %c18_75 = arith.constant 18 : index
    %94 = vector.load %arg6[%c0_74, %c18_75] : memref<8x324xf32, #tpu.memory_space<vmem>>, vector<8x286xf32>
    %c12 = arith.constant 12 : index
    %c0_76 = arith.constant 0 : index
    %c0_77 = arith.constant 0 : index
    %95 = vector.load %arg2[%c12, %c0_76, %c0_77] : memref<36x8x8xf32, #tpu.memory_space<vmem>>, vector<1x8x8xf32>
    %96 = vector.shape_cast %95 : vector<1x8x8xf32> to vector<8x8xf32>
    %cst_78 = arith.constant dense<0.000000e+00> : vector<8x286xf32>
    %97 = tpu.matmul %96, %94, %cst_78 {dimension_numbers = #tpu.dot_dimension_numbers<[1], [0], [0], [1], [0, 0, 1, 1], [], []>} : vector<8x8xf32>, vector<8x286xf32>, vector<8x286xf32> -> vector<8x286xf32>
    %98 = arith.addf %93, %97 : vector<8x286xf32>
    %c0_79 = arith.constant 0 : index
    %c19_80 = arith.constant 19 : index
    %99 = vector.load %arg6[%c0_79, %c19_80] : memref<8x324xf32, #tpu.memory_space<vmem>>, vector<8x286xf32>
    %c13 = arith.constant 13 : index
    %c0_81 = arith.constant 0 : index
    %c0_82 = arith.constant 0 : index
    %100 = vector.load %arg2[%c13, %c0_81, %c0_82] : memref<36x8x8xf32, #tpu.memory_space<vmem>>, vector<1x8x8xf32>
    %101 = vector.shape_cast %100 : vector<1x8x8xf32> to vector<8x8xf32>
    %cst_83 = arith.constant dense<0.000000e+00> : vector<8x286xf32>
    %102 = tpu.matmul %101, %99, %cst_83 {dimension_numbers = #tpu.dot_dimension_numbers<[1], [0], [0], [1], [0, 0, 1, 1], [], []>} : vector<8x8xf32>, vector<8x286xf32>, vector<8x286xf32> -> vector<8x286xf32>
    %103 = arith.addf %98, %102 : vector<8x286xf32>
    %c0_84 = arith.constant 0 : index
    %c20_85 = arith.constant 20 : index
    %104 = vector.load %arg6[%c0_84, %c20_85] : memref<8x324xf32, #tpu.memory_space<vmem>>, vector<8x286xf32>
    %c14 = arith.constant 14 : index
    %c0_86 = arith.constant 0 : index
    %c0_87 = arith.constant 0 : index
    %105 = vector.load %arg2[%c14, %c0_86, %c0_87] : memref<36x8x8xf32, #tpu.memory_space<vmem>>, vector<1x8x8xf32>
    %106 = vector.shape_cast %105 : vector<1x8x8xf32> to vector<8x8xf32>
    %cst_88 = arith.constant dense<0.000000e+00> : vector<8x286xf32>
    %107 = tpu.matmul %106, %104, %cst_88 {dimension_numbers = #tpu.dot_dimension_numbers<[1], [0], [0], [1], [0, 0, 1, 1], [], []>} : vector<8x8xf32>, vector<8x286xf32>, vector<8x286xf32> -> vector<8x286xf32>
    %108 = arith.addf %103, %107 : vector<8x286xf32>
    %c0_89 = arith.constant 0 : index
    %c36_90 = arith.constant 36 : index
    %109 = vector.load %arg6[%c0_89, %c36_90] : memref<8x324xf32, #tpu.memory_space<vmem>>, vector<8x286xf32>
    %c15 = arith.constant 15 : index
    %c0_91 = arith.constant 0 : index
    %c0_92 = arith.constant 0 : index
    %110 = vector.load %arg2[%c15, %c0_91, %c0_92] : memref<36x8x8xf32, #tpu.memory_space<vmem>>, vector<1x8x8xf32>
    %111 = vector.shape_cast %110 : vector<1x8x8xf32> to vector<8x8xf32>
    %cst_93 = arith.constant dense<0.000000e+00> : vector<8x286xf32>
    %112 = tpu.matmul %111, %109, %cst_93 {dimension_numbers = #tpu.dot_dimension_numbers<[1], [0], [0], [1], [0, 0, 1, 1], [], []>} : vector<8x8xf32>, vector<8x286xf32>, vector<8x286xf32> -> vector<8x286xf32>
    %113 = arith.addf %108, %112 : vector<8x286xf32>
    %c0_94 = arith.constant 0 : index
    %c37_95 = arith.constant 37 : index
    %114 = vector.load %arg6[%c0_94, %c37_95] : memref<8x324xf32, #tpu.memory_space<vmem>>, vector<8x286xf32>
    %c16 = arith.constant 16 : index
    %c0_96 = arith.constant 0 : index
    %c0_97 = arith.constant 0 : index
    %115 = vector.load %arg2[%c16, %c0_96, %c0_97] : memref<36x8x8xf32, #tpu.memory_space<vmem>>, vector<1x8x8xf32>
    %116 = vector.shape_cast %115 : vector<1x8x8xf32> to vector<8x8xf32>
    %cst_98 = arith.constant dense<0.000000e+00> : vector<8x286xf32>
    %117 = tpu.matmul %116, %114, %cst_98 {dimension_numbers = #tpu.dot_dimension_numbers<[1], [0], [0], [1], [0, 0, 1, 1], [], []>} : vector<8x8xf32>, vector<8x286xf32>, vector<8x286xf32> -> vector<8x286xf32>
    %118 = arith.addf %113, %117 : vector<8x286xf32>
    %c0_99 = arith.constant 0 : index
    %c38_100 = arith.constant 38 : index
    %119 = vector.load %arg6[%c0_99, %c38_100] : memref<8x324xf32, #tpu.memory_space<vmem>>, vector<8x286xf32>
    %c17 = arith.constant 17 : index
    %c0_101 = arith.constant 0 : index
    %c0_102 = arith.constant 0 : index
    %120 = vector.load %arg2[%c17, %c0_101, %c0_102] : memref<36x8x8xf32, #tpu.memory_space<vmem>>, vector<1x8x8xf32>
    %121 = vector.shape_cast %120 : vector<1x8x8xf32> to vector<8x8xf32>
    %cst_103 = arith.constant dense<0.000000e+00> : vector<8x286xf32>
    %122 = tpu.matmul %121, %119, %cst_103 {dimension_numbers = #tpu.dot_dimension_numbers<[1], [0], [0], [1], [0, 0, 1, 1], [], []>} : vector<8x8xf32>, vector<8x286xf32>, vector<8x286xf32> -> vector<8x286xf32>
    %123 = arith.addf %118, %122 : vector<8x286xf32>
    %c1_104 = arith.constant 1 : index
    %c0_105 = arith.constant 0 : index
    %c0_106 = arith.constant 0 : index
    %124 = vector.load %arg3[%c1_104, %c0_105, %c0_106] : memref<4x8x1xf32, #tpu.memory_space<vmem>>, vector<1x8x1xf32>
    %125 = vector.shape_cast %124 : vector<1x8x1xf32> to vector<8x1xf32>
    %126 = vector.broadcast %125 : vector<8x1xf32> to vector<8x286xf32>
    %127 = arith.addf %123, %126 : vector<8x286xf32>
    %128 = vector.broadcast %3 : vector<1x286xf32> to vector<8x286xf32>
    %129 = arith.mulf %127, %128 : vector<8x286xf32>
    %cst_107 = arith.constant dense<0.000000e+00> : vector<8xf32>
    %130 = vector.multi_reduction <add>, %129, %cst_107 [1] : vector<8x286xf32> to vector<8xf32>
    %131 = vector.shape_cast %130 : vector<8xf32> to vector<8x1xf32>
    %132 = arith.mulf %129, %129 : vector<8x286xf32>
    %cst_108 = arith.constant dense<0.000000e+00> : vector<8xf32>
    %133 = vector.multi_reduction <add>, %132, %cst_108 [1] : vector<8x286xf32> to vector<8xf32>
    %134 = vector.shape_cast %133 : vector<8xf32> to vector<8x1xf32>
    %cst_109 = arith.constant 3.906250e-03 : f32
    %135 = vector.broadcast %cst_109 : f32 to vector<8x1xf32>
    %136 = arith.mulf %131, %135 : vector<8x1xf32>
    %cst_110 = arith.constant 3.906250e-03 : f32
    %137 = vector.broadcast %cst_110 : f32 to vector<8x1xf32>
    %138 = arith.mulf %134, %137 : vector<8x1xf32>
    %139 = arith.mulf %136, %136 : vector<8x1xf32>
    %140 = arith.subf %138, %139 : vector<8x1xf32>
    %cst_111 = arith.constant 0.000000e+00 : f32
    %141 = vector.broadcast %cst_111 : f32 to vector<8x1xf32>
    %142 = arith.maximumf %140, %141 : vector<8x1xf32>
    %143 = vector.broadcast %136 : vector<8x1xf32> to vector<8x286xf32>
    %144 = arith.subf %127, %143 : vector<8x286xf32>
    %cst_112 = arith.constant 9.99999974E-6 : f32
    %145 = vector.broadcast %cst_112 : f32 to vector<8x1xf32>
    %146 = arith.addf %142, %145 : vector<8x1xf32>
    %147 = math.rsqrt %146 : vector<8x1xf32>
    %148 = vector.broadcast %147 : vector<8x1xf32> to vector<8x286xf32>
    %149 = arith.mulf %144, %148 : vector<8x286xf32>
    %150 = arith.addf %149, %4 : vector<8x286xf32>
    %151 = vector.broadcast %3 : vector<1x286xf32> to vector<8x286xf32>
    %152 = arith.mulf %150, %151 : vector<8x286xf32>
    %c0_113 = arith.constant 0 : index
    %c19_114 = arith.constant 19 : index
    %153 = vector.load %arg6[%c0_113, %c19_114] : memref<8x324xf32, #tpu.memory_space<vmem>>, vector<8x286xf32>
    tpu.vector_store %arg6[%c0_113, %c19_114], %152 {strides = array<i32>} : memref<8x324xf32, #tpu.memory_space<vmem>>, vector<8x286xf32>,
    %c0_115 = arith.constant 0 : index
    %c19_116 = arith.constant 19 : index
    %154 = vector.load %arg6[%c0_115, %c19_116] : memref<8x324xf32, #tpu.memory_space<vmem>>, vector<8x286xf32>
    %c0_117 = arith.constant 0 : index
    %c0_118 = arith.constant 0 : index
    %155 = vector.load %arg6[%c0_117, %c0_118] : memref<8x324xf32, #tpu.memory_space<vmem>>, vector<8x286xf32>
    %c18_119 = arith.constant 18 : index
    %c0_120 = arith.constant 0 : index
    %c0_121 = arith.constant 0 : index
    %156 = vector.load %arg2[%c18_119, %c0_120, %c0_121] : memref<36x8x8xf32, #tpu.memory_space<vmem>>, vector<1x8x8xf32>
    %157 = vector.shape_cast %156 : vector<1x8x8xf32> to vector<8x8xf32>
    %cst_122 = arith.constant dense<0.000000e+00> : vector<8x286xf32>
    %158 = tpu.matmul %157, %155, %cst_122 {dimension_numbers = #tpu.dot_dimension_numbers<[1], [0], [0], [1], [0, 0, 1, 1], [], []>} : vector<8x8xf32>, vector<8x286xf32>, vector<8x286xf32> -> vector<8x286xf32>
    %c0_123 = arith.constant 0 : index
    %c1_124 = arith.constant 1 : index
    %159 = vector.load %arg6[%c0_123, %c1_124] : memref<8x324xf32, #tpu.memory_space<vmem>>, vector<8x286xf32>
    %c19_125 = arith.constant 19 : index
    %c0_126 = arith.constant 0 : index
    %c0_127 = arith.constant 0 : index
    %160 = vector.load %arg2[%c19_125, %c0_126, %c0_127] : memref<36x8x8xf32, #tpu.memory_space<vmem>>, vector<1x8x8xf32>
    %161 = vector.shape_cast %160 : vector<1x8x8xf32> to vector<8x8xf32>
    %cst_128 = arith.constant dense<0.000000e+00> : vector<8x286xf32>
    %162 = tpu.matmul %161, %159, %cst_128 {dimension_numbers = #tpu.dot_dimension_numbers<[1], [0], [0], [1], [0, 0, 1, 1], [], []>} : vector<8x8xf32>, vector<8x286xf32>, vector<8x286xf32> -> vector<8x286xf32>
    %163 = arith.addf %158, %162 : vector<8x286xf32>
    %c0_129 = arith.constant 0 : index
    %c2_130 = arith.constant 2 : index
    %164 = vector.load %arg6[%c0_129, %c2_130] : memref<8x324xf32, #tpu.memory_space<vmem>>, vector<8x286xf32>
    %c20_131 = arith.constant 20 : index
    %c0_132 = arith.constant 0 : index
    %c0_133 = arith.constant 0 : index
    %165 = vector.load %arg2[%c20_131, %c0_132, %c0_133] : memref<36x8x8xf32, #tpu.memory_space<vmem>>, vector<1x8x8xf32>
    %166 = vector.shape_cast %165 : vector<1x8x8xf32> to vector<8x8xf32>
    %cst_134 = arith.constant dense<0.000000e+00> : vector<8x286xf32>
    %167 = tpu.matmul %166, %164, %cst_134 {dimension_numbers = #tpu.dot_dimension_numbers<[1], [0], [0], [1], [0, 0, 1, 1], [], []>} : vector<8x8xf32>, vector<8x286xf32>, vector<8x286xf32> -> vector<8x286xf32>
    %168 = arith.addf %163, %167 : vector<8x286xf32>
    %c0_135 = arith.constant 0 : index
    %c18_136 = arith.constant 18 : index
    %169 = vector.load %arg6[%c0_135, %c18_136] : memref<8x324xf32, #tpu.memory_space<vmem>>, vector<8x286xf32>
    %c21 = arith.constant 21 : index
    %c0_137 = arith.constant 0 : index
    %c0_138 = arith.constant 0 : index
    %170 = vector.load %arg2[%c21, %c0_137, %c0_138] : memref<36x8x8xf32, #tpu.memory_space<vmem>>, vector<1x8x8xf32>
    %171 = vector.shape_cast %170 : vector<1x8x8xf32> to vector<8x8xf32>
    %cst_139 = arith.constant dense<0.000000e+00> : vector<8x286xf32>
    %172 = tpu.matmul %171, %169, %cst_139 {dimension_numbers = #tpu.dot_dimension_numbers<[1], [0], [0], [1], [0, 0, 1, 1], [], []>} : vector<8x8xf32>, vector<8x286xf32>, vector<8x286xf32> -> vector<8x286xf32>
    %173 = arith.addf %168, %172 : vector<8x286xf32>
    %c0_140 = arith.constant 0 : index
    %c19_141 = arith.constant 19 : index
    %174 = vector.load %arg6[%c0_140, %c19_141] : memref<8x324xf32, #tpu.memory_space<vmem>>, vector<8x286xf32>
    %c22 = arith.constant 22 : index
    %c0_142 = arith.constant 0 : index
    %c0_143 = arith.constant 0 : index
    %175 = vector.load %arg2[%c22, %c0_142, %c0_143] : memref<36x8x8xf32, #tpu.memory_space<vmem>>, vector<1x8x8xf32>
    %176 = vector.shape_cast %175 : vector<1x8x8xf32> to vector<8x8xf32>
    %cst_144 = arith.constant dense<0.000000e+00> : vector<8x286xf32>
    %177 = tpu.matmul %176, %174, %cst_144 {dimension_numbers = #tpu.dot_dimension_numbers<[1], [0], [0], [1], [0, 0, 1, 1], [], []>} : vector<8x8xf32>, vector<8x286xf32>, vector<8x286xf32> -> vector<8x286xf32>
    %178 = arith.addf %173, %177 : vector<8x286xf32>
    %c0_145 = arith.constant 0 : index
    %c20_146 = arith.constant 20 : index
    %179 = vector.load %arg6[%c0_145, %c20_146] : memref<8x324xf32, #tpu.memory_space<vmem>>, vector<8x286xf32>
    %c23 = arith.constant 23 : index
    %c0_147 = arith.constant 0 : index
    %c0_148 = arith.constant 0 : index
    %180 = vector.load %arg2[%c23, %c0_147, %c0_148] : memref<36x8x8xf32, #tpu.memory_space<vmem>>, vector<1x8x8xf32>
    %181 = vector.shape_cast %180 : vector<1x8x8xf32> to vector<8x8xf32>
    %cst_149 = arith.constant dense<0.000000e+00> : vector<8x286xf32>
    %182 = tpu.matmul %181, %179, %cst_149 {dimension_numbers = #tpu.dot_dimension_numbers<[1], [0], [0], [1], [0, 0, 1, 1], [], []>} : vector<8x8xf32>, vector<8x286xf32>, vector<8x286xf32> -> vector<8x286xf32>
    %183 = arith.addf %178, %182 : vector<8x286xf32>
    %c0_150 = arith.constant 0 : index
    %c36_151 = arith.constant 36 : index
    %184 = vector.load %arg6[%c0_150, %c36_151] : memref<8x324xf32, #tpu.memory_space<vmem>>, vector<8x286xf32>
    %c24 = arith.constant 24 : index
    %c0_152 = arith.constant 0 : index
    %c0_153 = arith.constant 0 : index
    %185 = vector.load %arg2[%c24, %c0_152, %c0_153] : memref<36x8x8xf32, #tpu.memory_space<vmem>>, vector<1x8x8xf32>
    %186 = vector.shape_cast %185 : vector<1x8x8xf32> to vector<8x8xf32>
    %cst_154 = arith.constant dense<0.000000e+00> : vector<8x286xf32>
    %187 = tpu.matmul %186, %184, %cst_154 {dimension_numbers = #tpu.dot_dimension_numbers<[1], [0], [0], [1], [0, 0, 1, 1], [], []>} : vector<8x8xf32>, vector<8x286xf32>, vector<8x286xf32> -> vector<8x286xf32>
    %188 = arith.addf %183, %187 : vector<8x286xf32>
    %c0_155 = arith.constant 0 : index
    %c37_156 = arith.constant 37 : index
    %189 = vector.load %arg6[%c0_155, %c37_156] : memref<8x324xf32, #tpu.memory_space<vmem>>, vector<8x286xf32>
    %c25 = arith.constant 25 : index
    %c0_157 = arith.constant 0 : index
    %c0_158 = arith.constant 0 : index
    %190 = vector.load %arg2[%c25, %c0_157, %c0_158] : memref<36x8x8xf32, #tpu.memory_space<vmem>>, vector<1x8x8xf32>
    %191 = vector.shape_cast %190 : vector<1x8x8xf32> to vector<8x8xf32>
    %cst_159 = arith.constant dense<0.000000e+00> : vector<8x286xf32>
    %192 = tpu.matmul %191, %189, %cst_159 {dimension_numbers = #tpu.dot_dimension_numbers<[1], [0], [0], [1], [0, 0, 1, 1], [], []>} : vector<8x8xf32>, vector<8x286xf32>, vector<8x286xf32> -> vector<8x286xf32>
    %193 = arith.addf %188, %192 : vector<8x286xf32>
    %c0_160 = arith.constant 0 : index
    %c38_161 = arith.constant 38 : index
    %194 = vector.load %arg6[%c0_160, %c38_161] : memref<8x324xf32, #tpu.memory_space<vmem>>, vector<8x286xf32>
    %c26 = arith.constant 26 : index
    %c0_162 = arith.constant 0 : index
    %c0_163 = arith.constant 0 : index
    %195 = vector.load %arg2[%c26, %c0_162, %c0_163] : memref<36x8x8xf32, #tpu.memory_space<vmem>>, vector<1x8x8xf32>
    %196 = vector.shape_cast %195 : vector<1x8x8xf32> to vector<8x8xf32>
    %cst_164 = arith.constant dense<0.000000e+00> : vector<8x286xf32>
    %197 = tpu.matmul %196, %194, %cst_164 {dimension_numbers = #tpu.dot_dimension_numbers<[1], [0], [0], [1], [0, 0, 1, 1], [], []>} : vector<8x8xf32>, vector<8x286xf32>, vector<8x286xf32> -> vector<8x286xf32>
    %198 = arith.addf %193, %197 : vector<8x286xf32>
    %c2_165 = arith.constant 2 : index
    %c0_166 = arith.constant 0 : index
    %c0_167 = arith.constant 0 : index
    %199 = vector.load %arg3[%c2_165, %c0_166, %c0_167] : memref<4x8x1xf32, #tpu.memory_space<vmem>>, vector<1x8x1xf32>
    %200 = vector.shape_cast %199 : vector<1x8x1xf32> to vector<8x1xf32>
    %201 = vector.broadcast %200 : vector<8x1xf32> to vector<8x286xf32>
    %202 = arith.addf %198, %201 : vector<8x286xf32>
    %203 = vector.broadcast %3 : vector<1x286xf32> to vector<8x286xf32>
    %204 = arith.mulf %202, %203 : vector<8x286xf32>
    %cst_168 = arith.constant dense<0.000000e+00> : vector<8xf32>
    %205 = vector.multi_reduction <add>, %204, %cst_168 [1] : vector<8x286xf32> to vector<8xf32>
    %206 = vector.shape_cast %205 : vector<8xf32> to vector<8x1xf32>
    %207 = arith.mulf %204, %204 : vector<8x286xf32>
    %cst_169 = arith.constant dense<0.000000e+00> : vector<8xf32>
    %208 = vector.multi_reduction <add>, %207, %cst_169 [1] : vector<8x286xf32> to vector<8xf32>
    %209 = vector.shape_cast %208 : vector<8xf32> to vector<8x1xf32>
    %cst_170 = arith.constant 3.906250e-03 : f32
    %210 = vector.broadcast %cst_170 : f32 to vector<8x1xf32>
    %211 = arith.mulf %206, %210 : vector<8x1xf32>
    %cst_171 = arith.constant 3.906250e-03 : f32
    %212 = vector.broadcast %cst_171 : f32 to vector<8x1xf32>
    %213 = arith.mulf %209, %212 : vector<8x1xf32>
    %214 = arith.mulf %211, %211 : vector<8x1xf32>
    %215 = arith.subf %213, %214 : vector<8x1xf32>
    %cst_172 = arith.constant 0.000000e+00 : f32
    %216 = vector.broadcast %cst_172 : f32 to vector<8x1xf32>
    %217 = arith.maximumf %215, %216 : vector<8x1xf32>
    %218 = vector.broadcast %211 : vector<8x1xf32> to vector<8x286xf32>
    %219 = arith.subf %202, %218 : vector<8x286xf32>
    %cst_173 = arith.constant 9.99999974E-6 : f32
    %220 = vector.broadcast %cst_173 : f32 to vector<8x1xf32>
    %221 = arith.addf %217, %220 : vector<8x1xf32>
    %222 = math.rsqrt %221 : vector<8x1xf32>
    %223 = vector.broadcast %222 : vector<8x1xf32> to vector<8x286xf32>
    %224 = arith.mulf %219, %223 : vector<8x286xf32>
    %cst_174 = arith.constant 0.000000e+00 : f32
    %225 = vector.broadcast %cst_174 : f32 to vector<8x286xf32>
    %226 = arith.maximumf %224, %225 : vector<8x286xf32>
    %227 = vector.broadcast %3 : vector<1x286xf32> to vector<8x286xf32>
    %228 = arith.mulf %226, %227 : vector<8x286xf32>
    %c0_175 = arith.constant 0 : index
    %c19_176 = arith.constant 19 : index
    %229 = vector.load %arg6[%c0_175, %c19_176] : memref<8x324xf32, #tpu.memory_space<vmem>>, vector<8x286xf32>
    tpu.vector_store %arg6[%c0_175, %c19_176], %228 {strides = array<i32>} : memref<8x324xf32, #tpu.memory_space<vmem>>, vector<8x286xf32>,
    %c0_177 = arith.constant 0 : index
    %c0_178 = arith.constant 0 : index
    %230 = vector.load %arg6[%c0_177, %c0_178] : memref<8x324xf32, #tpu.memory_space<vmem>>, vector<8x286xf32>
    %c27 = arith.constant 27 : index
    %c0_179 = arith.constant 0 : index
    %c0_180 = arith.constant 0 : index
    %231 = vector.load %arg2[%c27, %c0_179, %c0_180] : memref<36x8x8xf32, #tpu.memory_space<vmem>>, vector<1x8x8xf32>
    %232 = vector.shape_cast %231 : vector<1x8x8xf32> to vector<8x8xf32>
    %cst_181 = arith.constant dense<0.000000e+00> : vector<8x286xf32>
    %233 = tpu.matmul %232, %230, %cst_181 {dimension_numbers = #tpu.dot_dimension_numbers<[1], [0], [0], [1], [0, 0, 1, 1], [], []>} : vector<8x8xf32>, vector<8x286xf32>, vector<8x286xf32> -> vector<8x286xf32>
    %c0_182 = arith.constant 0 : index
    %c1_183 = arith.constant 1 : index
    %234 = vector.load %arg6[%c0_182, %c1_183] : memref<8x324xf32, #tpu.memory_space<vmem>>, vector<8x286xf32>
    %c28 = arith.constant 28 : index
    %c0_184 = arith.constant 0 : index
    %c0_185 = arith.constant 0 : index
    %235 = vector.load %arg2[%c28, %c0_184, %c0_185] : memref<36x8x8xf32, #tpu.memory_space<vmem>>, vector<1x8x8xf32>
    %236 = vector.shape_cast %235 : vector<1x8x8xf32> to vector<8x8xf32>
    %cst_186 = arith.constant dense<0.000000e+00> : vector<8x286xf32>
    %237 = tpu.matmul %236, %234, %cst_186 {dimension_numbers = #tpu.dot_dimension_numbers<[1], [0], [0], [1], [0, 0, 1, 1], [], []>} : vector<8x8xf32>, vector<8x286xf32>, vector<8x286xf32> -> vector<8x286xf32>
    %238 = arith.addf %233, %237 : vector<8x286xf32>
    %c0_187 = arith.constant 0 : index
    %c2_188 = arith.constant 2 : index
    %239 = vector.load %arg6[%c0_187, %c2_188] : memref<8x324xf32, #tpu.memory_space<vmem>>, vector<8x286xf32>
    %c29 = arith.constant 29 : index
    %c0_189 = arith.constant 0 : index
    %c0_190 = arith.constant 0 : index
    %240 = vector.load %arg2[%c29, %c0_189, %c0_190] : memref<36x8x8xf32, #tpu.memory_space<vmem>>, vector<1x8x8xf32>
    %241 = vector.shape_cast %240 : vector<1x8x8xf32> to vector<8x8xf32>
    %cst_191 = arith.constant dense<0.000000e+00> : vector<8x286xf32>
    %242 = tpu.matmul %241, %239, %cst_191 {dimension_numbers = #tpu.dot_dimension_numbers<[1], [0], [0], [1], [0, 0, 1, 1], [], []>} : vector<8x8xf32>, vector<8x286xf32>, vector<8x286xf32> -> vector<8x286xf32>
    %243 = arith.addf %238, %242 : vector<8x286xf32>
    %c0_192 = arith.constant 0 : index
    %c18_193 = arith.constant 18 : index
    %244 = vector.load %arg6[%c0_192, %c18_193] : memref<8x324xf32, #tpu.memory_space<vmem>>, vector<8x286xf32>
    %c30 = arith.constant 30 : index
    %c0_194 = arith.constant 0 : index
    %c0_195 = arith.constant 0 : index
    %245 = vector.load %arg2[%c30, %c0_194, %c0_195] : memref<36x8x8xf32, #tpu.memory_space<vmem>>, vector<1x8x8xf32>
    %246 = vector.shape_cast %245 : vector<1x8x8xf32> to vector<8x8xf32>
    %cst_196 = arith.constant dense<0.000000e+00> : vector<8x286xf32>
    %247 = tpu.matmul %246, %244, %cst_196 {dimension_numbers = #tpu.dot_dimension_numbers<[1], [0], [0], [1], [0, 0, 1, 1], [], []>} : vector<8x8xf32>, vector<8x286xf32>, vector<8x286xf32> -> vector<8x286xf32>
    %248 = arith.addf %243, %247 : vector<8x286xf32>
    %c0_197 = arith.constant 0 : index
    %c19_198 = arith.constant 19 : index
    %249 = vector.load %arg6[%c0_197, %c19_198] : memref<8x324xf32, #tpu.memory_space<vmem>>, vector<8x286xf32>
    %c31 = arith.constant 31 : index
    %c0_199 = arith.constant 0 : index
    %c0_200 = arith.constant 0 : index
    %250 = vector.load %arg2[%c31, %c0_199, %c0_200] : memref<36x8x8xf32, #tpu.memory_space<vmem>>, vector<1x8x8xf32>
    %251 = vector.shape_cast %250 : vector<1x8x8xf32> to vector<8x8xf32>
    %cst_201 = arith.constant dense<0.000000e+00> : vector<8x286xf32>
    %252 = tpu.matmul %251, %249, %cst_201 {dimension_numbers = #tpu.dot_dimension_numbers<[1], [0], [0], [1], [0, 0, 1, 1], [], []>} : vector<8x8xf32>, vector<8x286xf32>, vector<8x286xf32> -> vector<8x286xf32>
    %253 = arith.addf %248, %252 : vector<8x286xf32>
    %c0_202 = arith.constant 0 : index
    %c20_203 = arith.constant 20 : index
    %254 = vector.load %arg6[%c0_202, %c20_203] : memref<8x324xf32, #tpu.memory_space<vmem>>, vector<8x286xf32>
    %c32 = arith.constant 32 : index
    %c0_204 = arith.constant 0 : index
    %c0_205 = arith.constant 0 : index
    %255 = vector.load %arg2[%c32, %c0_204, %c0_205] : memref<36x8x8xf32, #tpu.memory_space<vmem>>, vector<1x8x8xf32>
    %256 = vector.shape_cast %255 : vector<1x8x8xf32> to vector<8x8xf32>
    %cst_206 = arith.constant dense<0.000000e+00> : vector<8x286xf32>
    %257 = tpu.matmul %256, %254, %cst_206 {dimension_numbers = #tpu.dot_dimension_numbers<[1], [0], [0], [1], [0, 0, 1, 1], [], []>} : vector<8x8xf32>, vector<8x286xf32>, vector<8x286xf32> -> vector<8x286xf32>
    %258 = arith.addf %253, %257 : vector<8x286xf32>
    %c0_207 = arith.constant 0 : index
    %c36_208 = arith.constant 36 : index
    %259 = vector.load %arg6[%c0_207, %c36_208] : memref<8x324xf32, #tpu.memory_space<vmem>>, vector<8x286xf32>
    %c33 = arith.constant 33 : index
    %c0_209 = arith.constant 0 : index
    %c0_210 = arith.constant 0 : index
    %260 = vector.load %arg2[%c33, %c0_209, %c0_210] : memref<36x8x8xf32, #tpu.memory_space<vmem>>, vector<1x8x8xf32>
    %261 = vector.shape_cast %260 : vector<1x8x8xf32> to vector<8x8xf32>
    %cst_211 = arith.constant dense<0.000000e+00> : vector<8x286xf32>
    %262 = tpu.matmul %261, %259, %cst_211 {dimension_numbers = #tpu.dot_dimension_numbers<[1], [0], [0], [1], [0, 0, 1, 1], [], []>} : vector<8x8xf32>, vector<8x286xf32>, vector<8x286xf32> -> vector<8x286xf32>
    %263 = arith.addf %258, %262 : vector<8x286xf32>
    %c0_212 = arith.constant 0 : index
    %c37_213 = arith.constant 37 : index
    %264 = vector.load %arg6[%c0_212, %c37_213] : memref<8x324xf32, #tpu.memory_space<vmem>>, vector<8x286xf32>
    %c34 = arith.constant 34 : index
    %c0_214 = arith.constant 0 : index
    %c0_215 = arith.constant 0 : index
    %265 = vector.load %arg2[%c34, %c0_214, %c0_215] : memref<36x8x8xf32, #tpu.memory_space<vmem>>, vector<1x8x8xf32>
    %266 = vector.shape_cast %265 : vector<1x8x8xf32> to vector<8x8xf32>
    %cst_216 = arith.constant dense<0.000000e+00> : vector<8x286xf32>
    %267 = tpu.matmul %266, %264, %cst_216 {dimension_numbers = #tpu.dot_dimension_numbers<[1], [0], [0], [1], [0, 0, 1, 1], [], []>} : vector<8x8xf32>, vector<8x286xf32>, vector<8x286xf32> -> vector<8x286xf32>
    %268 = arith.addf %263, %267 : vector<8x286xf32>
    %c0_217 = arith.constant 0 : index
    %c38_218 = arith.constant 38 : index
    %269 = vector.load %arg6[%c0_217, %c38_218] : memref<8x324xf32, #tpu.memory_space<vmem>>, vector<8x286xf32>
    %c35 = arith.constant 35 : index
    %c0_219 = arith.constant 0 : index
    %c0_220 = arith.constant 0 : index
    %270 = vector.load %arg2[%c35, %c0_219, %c0_220] : memref<36x8x8xf32, #tpu.memory_space<vmem>>, vector<1x8x8xf32>
    %271 = vector.shape_cast %270 : vector<1x8x8xf32> to vector<8x8xf32>
    %cst_221 = arith.constant dense<0.000000e+00> : vector<8x286xf32>
    %272 = tpu.matmul %271, %269, %cst_221 {dimension_numbers = #tpu.dot_dimension_numbers<[1], [0], [0], [1], [0, 0, 1, 1], [], []>} : vector<8x8xf32>, vector<8x286xf32>, vector<8x286xf32> -> vector<8x286xf32>
    %273 = arith.addf %268, %272 : vector<8x286xf32>
    %c3_222 = arith.constant 3 : index
    %c0_223 = arith.constant 0 : index
    %c0_224 = arith.constant 0 : index
    %274 = vector.load %arg3[%c3_222, %c0_223, %c0_224] : memref<4x8x1xf32, #tpu.memory_space<vmem>>, vector<1x8x1xf32>
    %275 = vector.shape_cast %274 : vector<1x8x1xf32> to vector<8x1xf32>
    %276 = vector.broadcast %275 : vector<8x1xf32> to vector<8x286xf32>
    %277 = arith.addf %273, %276 : vector<8x286xf32>
    %278 = vector.broadcast %3 : vector<1x286xf32> to vector<8x286xf32>
    %279 = arith.mulf %277, %278 : vector<8x286xf32>
    %cst_225 = arith.constant dense<0.000000e+00> : vector<8xf32>
    %280 = vector.multi_reduction <add>, %279, %cst_225 [1] : vector<8x286xf32> to vector<8xf32>
    %281 = vector.shape_cast %280 : vector<8xf32> to vector<8x1xf32>
    %282 = arith.mulf %279, %279 : vector<8x286xf32>
    %cst_226 = arith.constant dense<0.000000e+00> : vector<8xf32>
    %283 = vector.multi_reduction <add>, %282, %cst_226 [1] : vector<8x286xf32> to vector<8xf32>
    %284 = vector.shape_cast %283 : vector<8xf32> to vector<8x1xf32>
    %cst_227 = arith.constant 3.906250e-03 : f32
    %285 = vector.broadcast %cst_227 : f32 to vector<8x1xf32>
    %286 = arith.mulf %281, %285 : vector<8x1xf32>
    %cst_228 = arith.constant 3.906250e-03 : f32
    %287 = vector.broadcast %cst_228 : f32 to vector<8x1xf32>
    %288 = arith.mulf %284, %287 : vector<8x1xf32>
    %289 = arith.mulf %286, %286 : vector<8x1xf32>
    %290 = arith.subf %288, %289 : vector<8x1xf32>
    %cst_229 = arith.constant 0.000000e+00 : f32
    %291 = vector.broadcast %cst_229 : f32 to vector<8x1xf32>
    %292 = arith.maximumf %290, %291 : vector<8x1xf32>
    %293 = vector.broadcast %286 : vector<8x1xf32> to vector<8x286xf32>
    %294 = arith.subf %277, %293 : vector<8x286xf32>
    %cst_230 = arith.constant 9.99999974E-6 : f32
    %295 = vector.broadcast %cst_230 : f32 to vector<8x1xf32>
    %296 = arith.addf %292, %295 : vector<8x1xf32>
    %297 = math.rsqrt %296 : vector<8x1xf32>
    %298 = vector.broadcast %297 : vector<8x1xf32> to vector<8x286xf32>
    %299 = arith.mulf %294, %298 : vector<8x286xf32>
    %300 = arith.addf %299, %154 : vector<8x286xf32>
    %301 = vector.broadcast %3 : vector<1x286xf32> to vector<8x286xf32>
    %302 = arith.mulf %300, %301 : vector<8x286xf32>
    %c0_231 = arith.constant 0 : index
    %c19_232 = arith.constant 19 : index
    %303 = vector.load %arg6[%c0_231, %c19_232] : memref<8x324xf32, #tpu.memory_space<vmem>>, vector<8x286xf32>
    tpu.vector_store %arg6[%c0_231, %c19_232], %302 {strides = array<i32>} : memref<8x324xf32, #tpu.memory_space<vmem>>, vector<8x286xf32>,
    %c0_233 = arith.constant 0 : index
    %c0_234 = arith.constant 0 : index
    %304 = vector.load %arg6[%c0_233, %c0_234] : memref<8x324xf32, #tpu.memory_space<vmem>>, vector<8x324xf32>
    %c0_235 = arith.constant 0 : index
    %c0_236 = arith.constant 0 : index
    %c0_237 = arith.constant 0 : index
    %305 = vector.load %arg5[%c0_235, %c0_236, %c0_237] : memref<1x8x324xf32, #tpu.memory_space<vmem>>, vector<1x8x324xf32>
    %306 = vector.shape_cast %305 : vector<1x8x324xf32> to vector<8x324xf32>
    %307 = vector.shape_cast %304 : vector<8x324xf32> to vector<1x8x324xf32>
    tpu.vector_store %arg5[%c0_235, %c0_236, %c0_237], %307 {strides = array<i32>} : memref<1x8x324xf32, #tpu.memory_space<vmem>>, vector<1x8x324xf32>,
    return
  }
  func.func @transform_0(%arg0: i32) -> (i32, i32, i32) {
    %c0_i32 = arith.constant 0 : i32
    %c0_i32_0 = arith.constant 0 : i32
    %c0_i32_1 = arith.constant 0 : i32
    return %arg0, %c0_i32, %c0_i32_0 : i32, i32, i32
  }
  func.func @transform_1(%arg0: i32) -> (i32, i32, i32) {
    %c0_i32 = arith.constant 0 : i32
    %c0_i32_0 = arith.constant 0 : i32
    %c0_i32_1 = arith.constant 0 : i32
    %c0_i32_2 = arith.constant 0 : i32
    return %c0_i32, %c0_i32_0, %c0_i32_1 : i32, i32, i32
  }
  func.func @transform_2(%arg0: i32) -> (i32, i32, i32) {
    %c0_i32 = arith.constant 0 : i32
    %c0_i32_0 = arith.constant 0 : i32
    %c0_i32_1 = arith.constant 0 : i32
    %c0_i32_2 = arith.constant 0 : i32
    return %c0_i32, %c0_i32_0, %c0_i32_1 : i32, i32, i32
  }
  func.func @transform_3(%arg0: i32) -> (i32, i32) {
    %c0_i32 = arith.constant 0 : i32
    %c0_i32_0 = arith.constant 0 : i32
    %c0_i32_1 = arith.constant 0 : i32
    return %c0_i32, %c0_i32_0 : i32, i32
  }
  func.func @transform_4(%arg0: i32) -> (i32, i32, i32) {
    %c0_i32 = arith.constant 0 : i32
    %c0_i32_0 = arith.constant 0 : i32
    %c0_i32_1 = arith.constant 0 : i32
    return %arg0, %c0_i32, %c0_i32_0 : i32, i32, i32
  }
}

</mosaic_0001>

<bundles_post_ra>
// kernel: tpu_custom_call.1
= control target key start
LH: loop header
LB: loop body
LE: loop exit
PB: predicated region body
PF: predicated region fallthrough
CT: control target
= control target key end

     0   :  { %9 = vsyncpa [#allocation4], 0  ;;  %s7580_s0 = inlined_call_operand.vmem [shape: f32[2,8,324], index: 0, kind: input, shape index: {}]   ;;  %s7581_s1 = inlined_call_operand.vmem [shape: f32[36,8,8], index: 1, kind: input, shape index: {}]   ;;  %s7582_s2 = inlined_call_operand.vmem [shape: f32[4,8,1], index: 2, kind: input, shape index: {}]   ;;  %s7583_s3 = inlined_call_operand.vmem [shape: f32[1,286], index: 3, kind: input, shape index: {}]   ;;  %s7584_s4 = inlined_call_operand.hbm [shape: f32[2,8,324], index: 4, kind: output, shape index: {}]  }
   0x1   :  { %11 = vsyncpa [#allocation4 + $0x1], 0  ;;  %s6875_s15 = smov 0   ;;  %s6877_s16 = smov 0  }
   0x2   :  { %s6879_s17 = smov 0   ;;  %s6881_s18 = smov 0  }
   0x3 LB: > { %s6896_s19 = sadd.s32 4294967295, %s6835_s18   ;;  %s6275_s20 = sadd.s32 4294967294, %s6835_s18   ;;  %s6835_s18 = sphi %s6881_s18, %s7590_s18   ;;  %s6831_s17 = sphi %s6879_s17, %s7589_s17   ;;  %s6827_s16 = sphi %s6877_s16, %s7588_s16   ;;  %s6823_s15 = sphi %s6875_s15, %s7587_s15  }
   0x4   : > { %s6900_s21 = sadd.s32 1, %s6835_s18   ;;  %s113_s22 = sadd.s32 1, %s6831_s17 }
   0x5   : > { %s110_s23 = ssub.s32 %s6835_s18, %s6900_s21  ;;  %p123_p0 = scmp.ne.s32.totalorder %s6831_s17, %s6827_s16 }
   0x6   : > { %p111_p1 = scmp.eq.s32.totalorder %s110_s23, 0  ;;  %p124_p2 = scmp.eq.s32.totalorder %s6896_s19, 1 }
   0x7   : > { %p129_p3 = scmp.ne.s32.totalorder %s6827_s16, %s6823_s15  ;;  %p130_p4 = scmp.eq.s32.totalorder %s6275_s20, 1 }
   0x8   : > { %s6911_s24 = scalar_select %p111_p1, %s6831_s17, %s113_s22  }
   0x9   : > { %p6913_p5 = por %p124_p2, %p123_p0  ;;  %p6917_p6 = por %p130_p4, %p129_p3 }
   0xa   : > { %p6278_p7 = scmp.ge.s32.totalorder %s6835_s18, 1  ;;  %p165_p8 = scmp.lt.s32.totalorder %s6835_s18, 3 }
   0xc   : > { %p166_p9 = pnand %p6278_p7, %p165_p8 }
   0xd   : > { %p191_p10 = scmp.lt.s32.totalorder (!%p166_p9), %s6896_s19, 1  ;;  %v6837_v0 = vmov (!%p166_p9), 0.0   ;;  %vm201_vm0 = vcmask (!%p166_p9), 556032   ;;  %s6838_s6 = smov (!%p166_p9), 127   ;;  %vm6839_vm1 = vmmov (!%p166_p9), 0   ;;  %v1641_v5 = vld [vmem:[%s7582_s2] sm:$0xff] (!%p166_p9) }
   0xe   : > { %169 = sbr.rel (%p166_p9) target bundleno = 2849 (0xb21), region = 36  ;;  %6465 = vmatprep.subr.mxu1 (!%p166_p9), %v6837_v0  ;;  %293 = vmatprep.mubr.f32.mxu0 (!%p166_p9), %v6837_v0  ;;  %s6840_s7 = smov (!%p166_p9), 126   ;;  %v6847_v6 = vmov (!%p166_p9), 0   ;;  %vm219_vm2 = vcmask (!%p166_p9), 1039360   ;;  %v6280_v13 = vld [vmem:[%s7581_s1 + $0x8] sm:$0xff] (!%p166_p9)  ;;  %vm225_vm3 = vcmask (!%p166_p9), 64512  }
   0xf   : > { %6467 = vmatprep.mubr.msk.f32.mxu1 (!%p166_p9), %vm6839_vm1, %v6837_v0  ;;  %s6841_s8 = smov (!%p166_p9), 110   ;;  %s6842_s9 = smov (!%p166_p9), 109   ;;  %6763 = vset.pattern.permute.xlu0 (!%p166_p9), %v6847_v6  ;;  %vm522_vm4 = vcmask (!%p166_p9), 1031168   ;;  %v207_v18 = vld [vmem:[%s7581_s1] sm:$0xff] (!%p166_p9)  ;;  %vm683_vm5 = vcmask (!%p166_p9), 900096   ;;  %v6285_v23 = vld [vmem:[%s7581_s1 + $0x10] sm:$0xff] (!%p166_p9) }
  0x10   : > { %s6843_s10 = smov (!%p166_p9), 108   ;;  %s6844_s11 = smov (!%p166_p9), 92   ;;  %6764 = vset.pattern.permute.xlu1 (!%p166_p9), %v6847_v6  ;;  %v6288_v26 = vld [vmem:[%s7581_s1 + $0x18] sm:$0xff] (!%p166_p9)  ;;  %vm844_vm6 = vcmask (!%p166_p9), 891904   ;;  %v6291_v29 = vld [vmem:[%s7581_s1 + $0x20] sm:$0xff] (!%p166_p9)  ;;  %v6294_v34 = vld [vmem:[%s7581_s1 + $0x28] sm:$0xff] (!%p166_p9) }
  0x11   : > { %s6845_s12 = smov (!%p166_p9), 91   ;;  %s6846_s13 = smov (!%p166_p9), 90   ;;  %vm1005_vm7 = vcmask (!%p166_p9), 883712   ;;  %v6297_v40 = vld [vmem:[%s7581_s1 + $0x30] sm:$0xff] (!%p166_p9)  ;;  %vm1166_vm8 = vcmask (!%p166_p9), 752640   ;;  %v6300_v43 = vld [vmem:[%s7581_s1 + $0x38] sm:$0xff] (!%p166_p9) }
  0x12   : > { %v6303_v47 = vld [vmem:[%s7581_s1 + $0x40] sm:$0xff] (!%p166_p9)  ;;  %vm1327_vm9 = vcmask (!%p166_p9), 744448   ;;  %vm1488_vm10 = vcmask (!%p166_p9), 736256   ;;  %vm1670_vm11 = vcmask (!%p166_p9), 244736   ;;  %vm1711_vm12 = vcmask (!%p166_p9), 154624  }
  0x13   : > { %vm1717_vm13 = vcmask (!%p166_p9), 1047704   ;;  %vm1720_vm14 = vcmask (!%p166_p9), 400384  }
  0x15   : > { %s192_s27 = scalar_select %p191_p10, %s6896_s19, 1 }
  0x17   : > { %s6710_s28 = smul.u32 24, %s192_s27  ;;  %s6848_s27 = smov 19  }
  0x19   : > { %s195_s5 = scalar_lea.vmem %s7580_s0, %s6710_s28 }
  0x1a   : > { %v197_v1 = vld [vmem:[%s195_s5 + $0x8] sm:$0xff]  ;;  %v6930_v2 = vld [vmem:[%s195_s5] sm:$0xff]  ;;  %v198_v3 = vld [vmem:[%s195_s5 + $0x10] sm:$0xff] }
  0x1b   : > { %215 = vrot.lane.b32.xlu0 %v197_v1, %s6838_s6  ;;  %199 = vst [vmem:[#allocation2] sm:$0xff] %v6930_v2  ;;  %213 = vrot.lane.b32.xlu1 %v6930_v2, %s6838_s6  ;;  %202 = vst.msk [vmem:[#allocation2 + $0x10] sm:$0xff] %vm201_vm0, %v198_v3 }
  0x1f   : > { %518 = vrot.lane.b32.xlu1 %v197_v1, %s6840_s7 }
  0x22   : > { %v206_v4 = vld [vmem:[#allocation2 + $0x10] sm:$0xff] }
  0x23   : > { %217 = vrot.lane.b32.xlu0 %v206_v4, %s6838_s6  ;;  %516 = vrot.lane.b32.xlu1 %v6930_v2, %s6840_s7 }
  0x27   : > { %520 = vrot.lane.b32.xlu0 %v206_v4, %s6840_s7  ;;  %681 = vrot.lane.b32.xlu1 %v206_v4, %s6841_s8 }
  0x2b   : > { %679 = vrot.lane.b32.xlu0 %v197_v1, %s6841_s8  ;;  %840 = vrot.lane.b32.xlu1 %v197_v1, %s6842_s9 }
  0x2f   : > { %677 = vrot.lane.b32.xlu0 %v6930_v2, %s6841_s8  ;;  %838 = vrot.lane.b32.xlu1 %v6930_v2, %s6842_s9 }
  0x33   : > { %842 = vrot.lane.b32.xlu0 %v206_v4, %s6842_s9  ;;  %1003 = vrot.lane.b32.xlu1 %v206_v4, %s6843_s10 }
  0x37   : > { %1001 = vrot.lane.b32.xlu0 %v197_v1, %s6843_s10  ;;  %1162 = vrot.lane.b32.xlu1 %v197_v1, %s6844_s11 }
  0x3b   : > { %999 = vrot.lane.b32.xlu0 %v6930_v2, %s6843_s10  ;;  %1160 = vrot.lane.b32.xlu1 %v6930_v2, %s6844_s11 }
  0x3f   : > { %1164 = vrot.lane.b32.xlu0 %v206_v4, %s6844_s11  ;;  %1325 = vrot.lane.b32.xlu1 %v206_v4, %s6845_s12 }
  0x43   : > { %1323 = vrot.lane.b32.xlu0 %v197_v1, %s6845_s12  ;;  %1484 = vrot.lane.b32.xlu1 %v197_v1, %s6846_s13 }
  0x47   : > { %1321 = vrot.lane.b32.xlu0 %v6930_v2, %s6845_s12  ;;  %1482 = vrot.lane.b32.xlu1 %v6930_v2, %s6846_s13 }
  0x4b   : > { %1486 = vrot.lane.b32.xlu0 %v206_v4, %s6846_s13 }
  0x4f   : > { %1644 = vperm.xlu0 %6763, %v1641_v5  }
  0x8d   : > { %v214_v7 = vpop.permute.xlu1 %213  ;;  %v216_v8 = vpop.permute.xlu0 %215 }
  0x8e   : > { %v220_v14 = vsel %vm219_vm2, %v214_v7, %v216_v8 }
  0x91   : > { %v519_v9 = vpop.permute.xlu1 %518 }
  0x95   : > { %v218_v10 = vpop.permute.xlu0 %217  ;;  %v517_v11 = vpop.permute.xlu1 %516 }
  0x96   : > { %6466 = vmatpush3.msra.mxu1 %v218_v10  ;;  %v221_v12 = vsel %vm219_vm2, %v216_v8, %v218_v10  ;;  %v523_v21 = vsel %vm522_vm4, %v517_v11, %v519_v9 }
  0x97   : > { %229 = vmatprep.subr.mxu0 %v221_v12  ;;  %6468 = vmatmul.mubr.msk.f32.vlgmr.msra.gmra.mrb[0].mxu1 %vm225_vm3, %v6280_v13 }
  0x98   : > { %230 = vmatpush1.msra.mxu0 %v220_v14  ;;  %6470 = vmatprep.subr.mxu1 %v6837_v0 }
  0x99   : > { %6281 = vmatmul.mubr.msk.f32.vlgmr.msra.gmra.mrb[0].mxu0 %vm225_vm3, %v6280_v13  ;;  %373 = vmatprep.subr.mxu0 %v197_v1  ;;  %v521_v15 = vpop.permute.xlu0 %520  ;;  %v682_v16 = vpop.permute.xlu1 %681 }
  0x9a   : > { %374 = vmatpush1.msra.mxu0 %v6930_v2  ;;  %437 = vmatprep.mubr.f32.mxu0 %v6837_v0  ;;  %v524_v17 = vsel %vm522_vm4, %v519_v9, %v521_v15 }
  0x9b   : > { %6471 = vmatpush3.msra.mxu1 %v206_v4  ;;  %531 = vmatprep.subr.mxu0 %v524_v17 }
  0x9c   : > { %6472 = vmatprep.mubr.msk.f32.mxu1 %vm6839_vm1, %v6837_v0  ;;  %6475 = vmatprep.subr.mxu1 %v6837_v0 }
  0x9d   : > { %6473 = vmatmul.mubr.msk.f32.vlgmr.msra.gmra.mrb[2].mxu1 %vm225_vm3, %v207_v18  ;;  %v680_v19 = vpop.permute.xlu0 %679  ;;  %v841_v20 = vpop.permute.xlu1 %840 }
  0x9e   : > { %6476 = vmatpush3.msra.mxu1 %v521_v15  ;;  %6477 = vmatprep.mubr.msk.f32.mxu1 %vm6839_vm1, %v6837_v0  ;;  %v685_v22 = vsel %vm683_vm5, %v680_v19, %v682_v16 }
  0x9f   : > { %6480 = vmatprep.subr.mxu1 %v6837_v0 }
  0xa1   : > { %6283 = vmatmul.mubr.msk.f32.vlgmr.msra.gmra.mrb[0].mxu0 %vm225_vm3, %v207_v18  ;;  %v678_v24 = vpop.permute.xlu0 %677  ;;  %6478 = vmatmul.mubr.msk.f32.vlgmr.msra.gmra.mrb[4].mxu1 %vm225_vm3, %v6285_v23  ;;  %v839_v25 = vpop.permute.xlu1 %838 }
  0xa2   : > { %532 = vmatpush1.msra.mxu0 %v523_v21  ;;  %595 = vmatprep.mubr.f32.mxu0 %v6837_v0  ;;  %v684_v30 = vsel %vm683_vm5, %v678_v24, %v680_v19  ;;  %v7035_v37 = vsel %vm844_vm6, %v839_v25, %v841_v20  ;;  %v1651_v19 = vlaneseq }
  0xa3   : > { %692 = vmatprep.subr.mxu0 %v685_v22  ;;  %6481 = vmatpush3.msra.mxu1 %v682_v16 }
  0xa4   : > { %6482 = vmatprep.mubr.msk.f32.mxu1 %vm6839_vm1, %v6837_v0  ;;  %6485 = vmatprep.subr.mxu1 %v6837_v0 }
  0xa5   : > { %v7006_v27 = vpop.permute.xlu0 %842  ;;  %6483 = vmatmul.mubr.msk.f32.vlgmr.msra.gmra.mrb[6].mxu1 %vm225_vm3, %v6288_v26  ;;  %v1004_v28 = vpop.permute.xlu1 %1003 }
  0xa6   : > { %6486 = vmatpush3.msra.mxu1 %v7006_v27  ;;  %6487 = vmatprep.mubr.msk.f32.mxu1 %vm6839_vm1, %v6837_v0  ;;  %v7019_v31 = vsel %vm844_vm6, %v841_v20, %v7006_v27  ;;  %v1652_v20 = vshrl.u32 %v1651_v19, 7 }
  0xa7   : > { %6490 = vmatprep.subr.mxu1 %v6837_v0 }
  0xa8   : > { %v1661_v21 = vsub.s32 2, %v1652_v20  ;;  %v1653_v24 = vsub.s32 0, %v1652_v20  ;;  %v1657_v25 = vsub.s32 1, %v1652_v20 }
  0xa9   : > { %6286 = vmatmul.mubr.msk.f32.vlgmr.msra.gmra.mrb[0].mxu0 %vm225_vm3, %v6285_v23  ;;  %v1002_v32 = vpop.permute.xlu0 %1001  ;;  %6488 = vmatmul.mubr.msk.f32.vlgmr.msra.gmra.mrb[8].mxu1 %vm225_vm3, %v6291_v29  ;;  %v1163_v33 = vpop.permute.xlu1 %1162  ;;  %v203_v23 = vld [vmem:[%s7583_s3] sm:$0x7] }
  0xaa   : > { %693 = vmatpush1.msra.mxu0 %v684_v30  ;;  %756 = vmatprep.mubr.f32.mxu0 %v6837_v0  ;;  %v1007_v38 = vsel %vm1005_vm7, %v1002_v32, %v1004_v28 }
  0xab   : > { %853 = vmatprep.subr.mxu0 %v7019_v31  ;;  %6491 = vmatpush3.msra.mxu1 %v1004_v28  ;;  %v7082_v28 = vrot.slane %v203_v23, %v1661_v21 }
  0xac   : > { %6492 = vmatprep.mubr.msk.f32.mxu1 %vm6839_vm1, %v6837_v0  ;;  %6495 = vmatprep.subr.mxu1 %v6837_v0 }
  0xad   : > { %v1000_v35 = vpop.permute.xlu0 %999  ;;  %6493 = vmatmul.mubr.msk.f32.vlgmr.msra.gmra.mrb[10].mxu1 %vm225_vm3, %v6294_v34  ;;  %v1161_v36 = vpop.permute.xlu1 %1160 }
  0xae   : > { %6497 = vmatprep.mubr.msk.f32.mxu1 %vm6839_vm1, %v6837_v0  ;;  %v1006_v44 = vsel %vm1005_vm7, %v1000_v35, %v1002_v32  ;;  %v1167_v49 = vsel %vm1166_vm8, %v1161_v36, %v1163_v33  ;;  %v7086_v32 = vrot.slane %v203_v23, %v1657_v25 }
  0xb1   : > { %6289 = vmatmul.mubr.msk.f32.vlgmr.msra.gmra.mrb[0].mxu0 %vm225_vm3, %v6288_v26  ;;  %v1165_v39 = vpop.permute.xlu0 %1164  ;;  %v1326_v41 = vpop.permute.xlu1 %1325 }
  0xb2   : > { %854 = vmatpush1.msra.mxu0 %v7035_v37  ;;  %917 = vmatprep.mubr.f32.mxu0 %v6837_v0  ;;  %v1168_v45 = vsel %vm1166_vm8, %v1163_v33, %v1165_v39 }
  0xb3   : > { %1014 = vmatprep.subr.mxu0 %v1007_v38  ;;  %6496 = vmatpush3.msra.mxu1 %v1165_v39 }
  0xb4   : > { %6498 = vmatmul.mubr.msk.f32.vlgmr.msra.gmra.mrb[12].mxu1 %vm225_vm3, %v6297_v40  ;;  %6500 = vmatprep.subr.mxu1 %v6837_v0 }
  0xb5   : > { %v1324_v42 = vpop.permute.xlu0 %1323  ;;  %6501 = vmatpush3.msra.mxu1 %v1326_v41  ;;  %6502 = vmatprep.mubr.msk.f32.mxu1 %vm6839_vm1, %v6837_v0  ;;  %v1485_v51 = vpop.permute.xlu1 %1484 }
  0xb6   : > { %6505 = vmatprep.subr.mxu1 %v6837_v0  ;;  %v1329_v50 = vsel %vm1327_vm9, %v1324_v42, %v1326_v41 }
  0xb8   : > { %6503 = vmatmul.mubr.msk.f32.vlgmr.msra.gmra.mrb[14].mxu1 %vm225_vm3, %v6300_v43 }
  0xb9   : > { %6292 = vmatmul.mubr.msk.f32.vlgmr.msra.gmra.mrb[0].mxu0 %vm225_vm3, %v6291_v29  ;;  %v1322_v46 = vpop.permute.xlu0 %1321  ;;  %6507 = vmatprep.mubr.msk.f32.mxu1 %vm6839_vm1, %v6837_v0  ;;  %v1483_v54 = vpop.permute.xlu1 %1482  ;;  %v7084_v29 = vrot.slane %v203_v23, %v1653_v24  ;;  %v6306_v23 = vld [vmem:[%s7581_s1 + $0x48] sm:$0xff] }
  0xba   : > { %1015 = vmatpush1.msra.mxu0 %v1006_v44  ;;  %1078 = vmatprep.mubr.f32.mxu0 %v6837_v0  ;;  %v1328_v52 = vsel %vm1327_vm9, %v1322_v46, %v1324_v42  ;;  %v1489_v55 = vsel %vm1488_vm10, %v1483_v54, %v1485_v51 }
  0xbb   : > { %1175 = vmatprep.subr.mxu0 %v1168_v45 }
  0xbd   : > { %v1487_v48 = vpop.permute.xlu0 %1486 }
  0xbe   : > { %6506 = vmatpush3.msra.mxu1 %v1487_v48  ;;  %v1490_v53 = vsel %vm1488_vm10, %v1485_v51, %v1487_v48 }
  0xbf   : > { %6508 = vmatmul.mubr.msk.f32.vlgmr.msra.gmra.mrb[16].mxu1 %vm225_vm3, %v6303_v47  ;;  %6510 = vmatprep.subr.mxu1 %v6837_v0 }
  0xc0   : > { %6512 = vmatprep.mubr.msk.f32.mxu1 %vm6839_vm1, %v6837_v0 }
  0xc1   : > { %6295 = vmatmul.mubr.msk.f32.vlgmr.msra.gmra.mrb[0].mxu0 %vm225_vm3, %v6294_v34 }
  0xc2   : > { %1176 = vmatpush1.msra.mxu0 %v1167_v49  ;;  %1239 = vmatprep.mubr.f32.mxu0 %v6837_v0 }
  0xc3   : > { %1336 = vmatprep.subr.mxu0 %v1329_v50 }
  0xc9   : > { %6298 = vmatmul.mubr.msk.f32.vlgmr.msra.gmra.mrb[0].mxu0 %vm225_vm3, %v6297_v40 }
  0xca   : > { %1337 = vmatpush1.msra.mxu0 %v1328_v52  ;;  %1400 = vmatprep.mubr.f32.mxu0 %v6837_v0 }
  0xcb   : > { %1497 = vmatprep.subr.mxu0 %v1490_v53 }
  0xce   : > { %v1645_v22 = vpop.permute.xlu0 %1644 }
  0xd1   : > { %6301 = vmatmul.mubr.msk.f32.vlgmr.msra.gmra.mrb[0].mxu0 %vm225_vm3, %v6300_v43 }
  0xd2   : > { %1498 = vmatpush1.msra.mxu0 %v1489_v55  ;;  %1561 = vmatprep.mubr.f32.mxu0 %v6837_v0 }
  0xd9   : > { %6304 = vmatmul.mubr.msk.f32.vlgmr.msra.gmra.mrb[0].mxu0 %vm225_vm3, %v6303_v47 }
  0xda   : > { %1810 = vmatprep.mubr.f32.mxu0 %v6837_v0 }
 0x16a   : > { %v366_v56 = vpop.f32.mrb[0].mxu1 }
 0x16b   : > { %v6469_v57 = vpop.f32.mrb[1].mxu1 }
 0x170   : > { %v510_v58 = vpop.f32.mrb[2].mxu1 }
 0x171   : > { %v511_v59 = vadd.f32 %v510_v58, %v366_v56  ;;  %v6474_v60 = vpop.f32.mrb[3].mxu1 }
 0x174   : > { %v668_v61 = vpop.f32.mrb[4].mxu1 }
 0x175   : > { %v674_v62 = vadd.f32 %v668_v61, %v511_v59  ;;  %v6479_v63 = vpop.f32.mrb[5].mxu1 }
 0x178   : > { %v829_v1 = vpop.f32.mrb[6].mxu1 }
 0x179   : > { %v835_v2 = vadd.f32 %v829_v1, %v674_v62  ;;  %v6484_v3 = vpop.f32.mrb[7].mxu1 }
 0x17c   : > { %v990_v4 = vpop.f32.mrb[8].mxu1 }
 0x17d   : > { %v996_v5 = vadd.f32 %v990_v4, %v835_v2  ;;  %v6489_v6 = vpop.f32.mrb[9].mxu1 }
 0x180   : > { %v1151_v7 = vpop.f32.mrb[10].mxu1 }
 0x181   : > { %v1157_v8 = vadd.f32 %v1151_v7, %v996_v5  ;;  %v6494_v9 = vpop.f32.mrb[11].mxu1 }
 0x187   : > { %v1312_v10 = vpop.f32.mrb[12].mxu1 }
 0x188   : > { %v1318_v11 = vadd.f32 %v1312_v10, %v1157_v8  ;;  %v6499_v12 = vpop.f32.mrb[13].mxu1 }
 0x18b   : > { %v1473_v13 = vpop.f32.mrb[14].mxu1 }
 0x18c   : > { %v1479_v14 = vadd.f32 %v1473_v13, %v1318_v11  ;;  %v6504_v15 = vpop.f32.mrb[15].mxu1 }
 0x192   : > { %v1634_v16 = vpop.f32.mrb[16].mxu1 }
 0x193   : > { %v1640_v17 = vadd.f32 %v1634_v16, %v1479_v14  ;;  %v6509_v18 = vpop.f32.mrb[17].mxu1  ;;  %v6333_v14 = vld [vmem:[%s7582_s2 + $0x8] sm:$0xff] }
 0x195   : > { %v1649_v26 = vadd.f32 %v1645_v22, %v1640_v17  ;;  %v6307_v17 = vld [vmem:[%s7581_s1 + $0x50] sm:$0xff] }
 0x197   : > { %v1668_v35 = vmul.f32 %v7082_v28, %v1649_v26 }
 0x199   : > { %v1677_v41 = vmul.f32 %v1668_v35, %v1668_v35  ;;  %v1671_v44 = vsel %vm1670_vm11, %v1668_v35, 0.0 }
 0x19b   : > { %v1679_v47 = vsel %vm1670_vm11, %v1677_v41, 0.0 }
 0x1ac   : > { %v1563_v30 = vpop.f32.mrb[0].mxu0 }
 0x1ad   : > { %v1647_v33 = vadd.f32 %v1645_v22, %v1563_v30  ;;  %v1565_v34 = vpop.f32.mrb[1].mxu0 }
 0x1ae   : > { %v1648_v36 = vadd.f32 %v1645_v22, %v1565_v34 }
 0x1af   : > { %v1666_v38 = vmul.f32 %v7084_v29, %v1647_v33 }
 0x1b0   : > { %v1667_v39 = vmul.f32 %v7086_v32, %v1648_v36 }
 0x1b1   : > { %v1675_v40 = vmul.f32 %v1666_v38, %v1666_v38 }
 0x1b2   : > { %v1676_v42 = vmul.f32 %v1667_v39, %v1667_v39  ;;  %v1669_v43 = vadd.f32 %v1667_v39, %v1666_v38  ;;  %v6315_v38 = vld [vmem:[%s7581_s1 + $0x60] sm:$0xff] }
 0x1b4   : > { %v1672_v45 = vadd.f32 %v1671_v44, %v1669_v43  ;;  %v1678_v46 = vadd.f32 %v1676_v42, %v1675_v40  ;;  %v6318_v42 = vld [vmem:[%s7581_s1 + $0x68] sm:$0xff] }
 0x1b6   : > { %1673 = vadd.xlane.f32.xlu1 %v1672_v45  ;;  %v1680_v48 = vadd.f32 %v1679_v47, %v1678_v46  ;;  %v6321_v47 = vld [vmem:[%s7581_s1 + $0x70] sm:$0xff] }
 0x1b8   : > { %1681 = vadd.xlane.f32.xlu0 %v1680_v48 }
 0x243   : > { %v1674_v49 = vpop.xlane.xlu1 %1673 }
 0x244   : > { %v1683_v50 = vmul.f32 0.00390625, %v1674_v49 }
 0x245   : > { %v1682_v51 = vpop.xlane.xlu0 %1681 }
 0x246   : > { %v1684_v52 = vmul.f32 0.00390625, %v1682_v51  ;;  %v1685_v53 = vmul.f32 %v1683_v50, %v1683_v50  ;;  %v1689_v57 = vsub.f32 %v1648_v36, %v1683_v50  ;;  %v1688_v58 = vsub.f32 %v1647_v33, %v1683_v50  ;;  %v6312_v33 = vld [vmem:[%s7581_s1 + $0x58] sm:$0xff] }
 0x247   : > { %v1690_v59 = vsub.f32 %v1649_v26, %v1683_v50  ;;  %v6324_v50 = vld [vmem:[%s7581_s1 + $0x78] sm:$0xff] }
 0x248   : > { %v1686_v54 = vsub.f32 %v1684_v52, %v1685_v53 }
 0x24a   : > { %v1687_v55 = vmax.f32 %v1686_v54, 0.0 }
 0x24c   : > { %v1691_v56 = vadd.f32 1e-05, %v1687_v55 }
 0x24e   : > { %6765 = vrsqrt.f32 %v1691_v56 }
 0x258   : > { %v6766_v60 = vpop.eup %6765 }
 0x259   : > { %v1694_v61 = vmul.f32 %v6766_v60, %v1689_v57  ;;  %v1693_v62 = vmul.f32 %v6766_v60, %v1688_v58  ;;  %v1695_v63 = vmul.f32 %v6766_v60, %v1690_v59  ;;  %v6327_v59 = vld [vmem:[%s7581_s1 + $0x80] sm:$0xff] }
 0x25b   : > { %v1697_v1 = vmax.f32 %v1694_v61, 0.0  ;;  %v1696_v2 = vmax.f32 %v1693_v62, 0.0  ;;  %v1698_v5 = vmax.f32 %v1695_v63, 0.0  ;;  %v6330_v62 = vld [vmem:[%s7581_s1 + $0x88] sm:$0xff] }
 0x25d   : > { %v1700_v3 = vmul.f32 %v1697_v1, %v7086_v32  ;;  %v1699_v4 = vmul.f32 %v1696_v2, %v7084_v29  ;;  %v1701_v6 = vmul.f32 %v1698_v5, %v7082_v28 }
 0x25f   : > { %1707 = vrot.lane.b32.xlu0 %v1700_v3, %s6848_s27  ;;  %1705 = vrot.lane.b32.xlu1 %v1699_v4, %s6848_s27 }
 0x263   : > { %1709 = vrot.lane.b32.xlu1 %v1701_v6, %s6848_s27 }
 0x2d1   : > { %v1708_v7 = vpop.permute.xlu0 %1707  ;;  %v1706_v8 = vpop.permute.xlu1 %1705 }
 0x2d2   : > { %v1712_v9 = vsel %vm1711_vm12, %v1706_v8, %v1708_v7  ;;  %1718 = vst.msk [vmem:[#allocation2] sm:$0xff] %vm1717_vm13, %v1706_v8 }
 0x2d3   : > { %1734 = vrot.lane.b32.xlu1 %v1712_v9, %s6838_s6 }
 0x2d5   : > { %v1710_v10 = vpop.permute.xlu1 %1709 }
 0x2d6   : > { %v1713_v11 = vsel %vm1711_vm12, %v1708_v7, %v1710_v10 }
 0x2d7   : > { %1721 = vst.msk [vmem:[#allocation2 + $0x10] sm:$0xff] %vm1720_vm14, %v1713_v11 }
 0x2d9   : > { %v1722_v12 = vld [vmem:[#allocation2] sm:$0xff] }
 0x2da   : > { %1732 = vrot.lane.b32.xlu1 %v1722_v12, %s6838_s6 }
 0x2de   : > { %v1724_v13 = vld [vmem:[#allocation2 + $0x10] sm:$0xff] }
 0x2df   : > { %1736 = vrot.lane.b32.xlu0 %v1724_v13, %s6838_s6  ;;  %2037 = vrot.lane.b32.xlu1 %v1724_v13, %s6840_s7 }
 0x2e3   : > { %2035 = vrot.lane.b32.xlu0 %v1712_v9, %s6840_s7  ;;  %2195 = vrot.lane.b32.xlu1 %v1712_v9, %s6841_s8 }
 0x2e7   : > { %2033 = vrot.lane.b32.xlu0 %v1722_v12, %s6840_s7  ;;  %2193 = vrot.lane.b32.xlu1 %v1722_v12, %s6841_s8 }
 0x2eb   : > { %2197 = vrot.lane.b32.xlu0 %v1724_v13, %s6841_s8  ;;  %2357 = vrot.lane.b32.xlu1 %v1724_v13, %s6842_s9 }
 0x2ef   : > { %2355 = vrot.lane.b32.xlu0 %v1712_v9, %s6842_s9  ;;  %2515 = vrot.lane.b32.xlu1 %v1712_v9, %s6843_s10 }
 0x2f3   : > { %2353 = vrot.lane.b32.xlu0 %v1722_v12, %s6842_s9  ;;  %2513 = vrot.lane.b32.xlu1 %v1722_v12, %s6843_s10 }
 0x2f7   : > { %2517 = vrot.lane.b32.xlu0 %v1724_v13, %s6843_s10  ;;  %2677 = vrot.lane.b32.xlu1 %v1724_v13, %s6844_s11 }
 0x2fb   : > { %2675 = vrot.lane.b32.xlu0 %v1712_v9, %s6844_s11  ;;  %2835 = vrot.lane.b32.xlu1 %v1712_v9, %s6845_s12 }
 0x2ff   : > { %2673 = vrot.lane.b32.xlu0 %v1722_v12, %s6844_s11  ;;  %2833 = vrot.lane.b32.xlu1 %v1722_v12, %s6845_s12 }
 0x303   : > { %2837 = vrot.lane.b32.xlu0 %v1724_v13, %s6845_s12  ;;  %2997 = vrot.lane.b32.xlu1 %v1724_v13, %s6846_s13 }
 0x307   : > { %2995 = vrot.lane.b32.xlu0 %v1712_v9, %s6846_s13  ;;  %3155 = vperm.xlu1 %6764, %v6333_v14  }
 0x30b   : > { %2993 = vrot.lane.b32.xlu0 %v1722_v12, %s6846_s13 }
 0x345   : > { %v1735_v15 = vpop.permute.xlu1 %1734 }
 0x34c   : > { %v1733_v16 = vpop.permute.xlu1 %1732 }
 0x34d   : > { %v1738_v21 = vsel %vm219_vm2, %v1733_v16, %v1735_v15 }
 0x351   : > { %v1737_v18 = vpop.permute.xlu0 %1736  ;;  %v2038_v19 = vpop.permute.xlu1 %2037 }
 0x352   : > { %6511 = vmatpush3.msra.mxu1 %v1737_v18  ;;  %v1739_v20 = vsel %vm219_vm2, %v1735_v15, %v1737_v18 }
 0x353   : > { %1746 = vmatprep.subr.mxu0 %v1739_v20  ;;  %6513 = vmatmul.mubr.msk.f32.vlgmr.msra.gmra.mrb[18].mxu1 %vm225_vm3, %v6307_v17 }
 0x354   : > { %6515 = vmatprep.subr.mxu1 %v6837_v0  ;;  %1747 = vmatpush1.msra.mxu0 %v1738_v21 }
 0x355   : > { %6516 = vmatpush3.msra.mxu1 %v1724_v13  ;;  %v2036_v22 = vpop.permute.xlu0 %2035  ;;  %6308 = vmatmul.mubr.msk.f32.vlgmr.msra.gmra.mrb[2].mxu0 %vm225_vm3, %v6307_v17  ;;  %v2196_v24 = vpop.permute.xlu1 %2195 }
 0x356   : > { %1890 = vmatprep.subr.mxu0 %v1712_v9  ;;  %6517 = vmatprep.mubr.msk.f32.mxu1 %vm6839_vm1, %v6837_v0  ;;  %v2040_v25 = vsel %vm522_vm4, %v2036_v22, %v2038_v19 }
 0x357   : > { %1891 = vmatpush1.msra.mxu0 %v1722_v12  ;;  %6520 = vmatprep.subr.mxu1 %v6837_v0 }
 0x358   : > { %6518 = vmatmul.mubr.msk.f32.vlgmr.msra.gmra.mrb[20].mxu1 %vm225_vm3, %v6306_v23  ;;  %2047 = vmatprep.subr.mxu0 %v2040_v25 }
 0x359   : > { %6521 = vmatpush3.msra.mxu1 %v2038_v19  ;;  %v2034_v26 = vpop.permute.xlu0 %2033  ;;  %1954 = vmatprep.mubr.f32.mxu0 %v6837_v0  ;;  %v2194_v30 = vpop.permute.xlu1 %2193 }
 0x35a   : > { %6522 = vmatprep.mubr.msk.f32.mxu1 %vm6839_vm1, %v6837_v0  ;;  %6525 = vmatprep.subr.mxu1 %v6837_v0  ;;  %v2039_v34 = vsel %vm522_vm4, %v2034_v26, %v2036_v22  ;;  %v2199_v43 = vsel %vm683_vm5, %v2194_v30, %v2196_v24 }
 0x35c   : > { %6523 = vmatmul.mubr.msk.f32.vlgmr.msra.gmra.mrb[22].mxu1 %vm225_vm3, %v6312_v33 }
 0x35d   : > { %v2198_v35 = vpop.permute.xlu0 %2197  ;;  %6310 = vmatmul.mubr.msk.f32.vlgmr.msra.gmra.mrb[2].mxu0 %vm225_vm3, %v6306_v23  ;;  %6527 = vmatprep.mubr.msk.f32.mxu1 %vm6839_vm1, %v6837_v0  ;;  %v2358_v36 = vpop.permute.xlu1 %2357 }
 0x35e   : > { %2048 = vmatpush1.msra.mxu0 %v2039_v34  ;;  %6526 = vmatpush3.msra.mxu1 %v2198_v35  ;;  %v2200_v39 = vsel %vm683_vm5, %v2196_v24, %v2198_v35 }
 0x35f   : > { %2207 = vmatprep.subr.mxu0 %v2200_v39  ;;  %6530 = vmatprep.subr.mxu1 %v6837_v0 }
 0x360   : > { %6528 = vmatmul.mubr.msk.f32.vlgmr.msra.gmra.mrb[24].mxu1 %vm225_vm3, %v6315_v38  ;;  %2111 = vmatprep.mubr.f32.mxu0 %v6837_v0 }
 0x361   : > { %v2356_v40 = vpop.permute.xlu0 %2355  ;;  %6531 = vmatpush3.msra.mxu1 %v2358_v36  ;;  %v2516_v41 = vpop.permute.xlu1 %2515  ;;  %6532 = vmatprep.mubr.msk.f32.mxu1 %vm6839_vm1, %v6837_v0 }
 0x362   : > { %6535 = vmatprep.subr.mxu1 %v6837_v0  ;;  %v2360_v46 = vsel %vm844_vm6, %v2356_v40, %v2358_v36 }
 0x364   : > { %6533 = vmatmul.mubr.msk.f32.vlgmr.msra.gmra.mrb[26].mxu1 %vm225_vm3, %v6318_v42 }
 0x365   : > { %v2354_v44 = vpop.permute.xlu0 %2353  ;;  %6313 = vmatmul.mubr.msk.f32.vlgmr.msra.gmra.mrb[2].mxu0 %vm225_vm3, %v6312_v33  ;;  %v2514_v45 = vpop.permute.xlu1 %2513  ;;  %6537 = vmatprep.mubr.msk.f32.mxu1 %vm6839_vm1, %v6837_v0 }
 0x366   : > { %2208 = vmatpush1.msra.mxu0 %v2199_v43  ;;  %2271 = vmatprep.mubr.f32.mxu0 %v6837_v0  ;;  %v2359_v51 = vsel %vm844_vm6, %v2354_v44, %v2356_v40  ;;  %v2519_v57 = vsel %vm1005_vm7, %v2514_v45, %v2516_v41 }
 0x367   : > { %2367 = vmatprep.subr.mxu0 %v2360_v46 }
 0x369   : > { %v2518_v48 = vpop.permute.xlu0 %2517  ;;  %v2678_v49 = vpop.permute.xlu1 %2677 }
 0x36a   : > { %6536 = vmatpush3.msra.mxu1 %v2518_v48  ;;  %v2520_v54 = vsel %vm1005_vm7, %v2516_v41, %v2518_v48 }
 0x36b   : > { %6540 = vmatprep.subr.mxu1 %v6837_v0  ;;  %6538 = vmatmul.mubr.msk.f32.vlgmr.msra.gmra.mrb[28].mxu1 %vm225_vm3, %v6321_v47 }
 0x36c   : > { %6541 = vmatpush3.msra.mxu1 %v2678_v49  ;;  %6542 = vmatprep.mubr.msk.f32.mxu1 %vm6839_vm1, %v6837_v0 }
 0x36d   : > { %v2676_v52 = vpop.permute.xlu0 %2675  ;;  %6316 = vmatmul.mubr.msk.f32.vlgmr.msra.gmra.mrb[2].mxu0 %vm225_vm3, %v6315_v38  ;;  %v2836_v53 = vpop.permute.xlu1 %2835  ;;  %6545 = vmatprep.subr.mxu1 %v6837_v0 }
 0x36e   : > { %2368 = vmatpush1.msra.mxu0 %v2359_v51  ;;  %2431 = vmatprep.mubr.f32.mxu0 %v6837_v0  ;;  %v2680_v60 = vsel %vm1166_vm8, %v2676_v52, %v2678_v49 }
 0x36f   : > { %2527 = vmatprep.subr.mxu0 %v2520_v54  ;;  %6543 = vmatmul.mubr.msk.f32.vlgmr.msra.gmra.mrb[30].mxu1 %vm225_vm3, %v6324_v50 }
 0x370   : > { %6547 = vmatprep.mubr.msk.f32.mxu1 %vm6839_vm1, %v6837_v0 }
 0x371   : > { %v2674_v55 = vpop.permute.xlu0 %2673  ;;  %v2834_v56 = vpop.permute.xlu1 %2833 }
 0x372   : > { %v2679_v63 = vsel %vm1166_vm8, %v2674_v55, %v2676_v52  ;;  %v2839_v3 = vsel %vm1327_vm9, %v2834_v56, %v2836_v53 }
 0x375   : > { %v2838_v58 = vpop.permute.xlu0 %2837  ;;  %6319 = vmatmul.mubr.msk.f32.vlgmr.msra.gmra.mrb[2].mxu0 %vm225_vm3, %v6318_v42  ;;  %v2998_v61 = vpop.permute.xlu1 %2997 }
 0x376   : > { %2528 = vmatpush1.msra.mxu0 %v2519_v57  ;;  %6546 = vmatpush3.msra.mxu1 %v2838_v58  ;;  %v2840_v1 = vsel %vm1327_vm9, %v2836_v53, %v2838_v58 }
 0x377   : > { %2687 = vmatprep.subr.mxu0 %v2680_v60  ;;  %6550 = vmatprep.subr.mxu1 %v6837_v0 }
 0x378   : > { %6548 = vmatmul.mubr.msk.f32.vlgmr.msra.gmra.mrb[32].mxu1 %vm225_vm3, %v6327_v59  ;;  %2591 = vmatprep.mubr.f32.mxu0 %v6837_v0 }
 0x379   : > { %6551 = vmatpush3.msra.mxu1 %v2998_v61  ;;  %6552 = vmatprep.mubr.msk.f32.mxu1 %vm6839_vm1, %v6837_v0  ;;  %v2996_v2 = vpop.permute.xlu0 %2995 }
 0x37a   : > { %6555 = vmatprep.subr.mxu1 %v6837_v0  ;;  %v3000_v4 = vsel %vm1488_vm10, %v2996_v2, %v2998_v61 }
 0x37c   : > { %6553 = vmatmul.mubr.msk.f32.vlgmr.msra.gmra.mrb[34].mxu1 %vm225_vm3, %v6330_v62 }
 0x37d   : > { %6322 = vmatmul.mubr.msk.f32.vlgmr.msra.gmra.mrb[2].mxu0 %vm225_vm3, %v6321_v47  ;;  %6557 = vmatprep.mubr.msk.f32.mxu1 %vm6839_vm1, %v6837_v0  ;;  %v2994_v5 = vpop.permute.xlu0 %2993 }
 0x37e   : > { %2688 = vmatpush1.msra.mxu0 %v2679_v63  ;;  %2751 = vmatprep.mubr.f32.mxu0 %v6837_v0  ;;  %v2999_v6 = vsel %vm1488_vm10, %v2994_v5, %v2996_v2 }
 0x37f   : > { %2847 = vmatprep.subr.mxu0 %v2840_v1 }
 0x385   : > { %6325 = vmatmul.mubr.msk.f32.vlgmr.msra.gmra.mrb[2].mxu0 %vm225_vm3, %v6324_v50 }
 0x386   : > { %2848 = vmatpush1.msra.mxu0 %v2839_v3  ;;  %2911 = vmatprep.mubr.f32.mxu0 %v6837_v0  ;;  %v3156_v39 = vpop.permute.xlu1 %3155 }
 0x387   : > { %3007 = vmatprep.subr.mxu0 %v3000_v4 }
 0x38d   : > { %6328 = vmatmul.mubr.msk.f32.vlgmr.msra.gmra.mrb[2].mxu0 %vm225_vm3, %v6327_v59 }
 0x38e   : > { %3008 = vmatpush1.msra.mxu0 %v2999_v6  ;;  %3071 = vmatprep.mubr.f32.mxu0 %v6837_v0 }
 0x395   : > { %6331 = vmatmul.mubr.msk.f32.vlgmr.msra.gmra.mrb[2].mxu0 %vm225_vm3, %v6330_v62 }
 0x396   : > { %3301 = vmatprep.mubr.f32.mxu0 %v6837_v0 }
 0x426   : > { %v1883_v7 = vpop.f32.mrb[18].mxu1 }
 0x427   : > { %v6514_v8 = vpop.f32.mrb[19].mxu1 }
 0x42b   : > { %v2027_v9 = vpop.f32.mrb[20].mxu1 }
 0x42c   : > { %v2028_v10 = vadd.f32 %v2027_v9, %v1883_v7  ;;  %v6519_v11 = vpop.f32.mrb[21].mxu1 }
 0x42f   : > { %v2184_v12 = vpop.f32.mrb[22].mxu1 }
 0x430   : > { %v2190_v13 = vadd.f32 %v2184_v12, %v2028_v10  ;;  %v6524_v14 = vpop.f32.mrb[23].mxu1 }
 0x433   : > { %v2344_v15 = vpop.f32.mrb[24].mxu1 }
 0x434   : > { %v2350_v16 = vadd.f32 %v2344_v15, %v2190_v13  ;;  %v6529_v17 = vpop.f32.mrb[25].mxu1 }
 0x437   : > { %v2504_v18 = vpop.f32.mrb[26].mxu1 }
 0x438   : > { %v2510_v19 = vadd.f32 %v2504_v18, %v2350_v16  ;;  %v6534_v20 = vpop.f32.mrb[27].mxu1 }
 0x43e   : > { %v2664_v21 = vpop.f32.mrb[28].mxu1 }
 0x43f   : > { %v2670_v22 = vadd.f32 %v2664_v21, %v2510_v19  ;;  %v6539_v23 = vpop.f32.mrb[29].mxu1  ;;  %v6361_v19 = vld [vmem:[%s7582_s2 + $0x10] sm:$0xff] }
 0x442   : > { %v2824_v24 = vpop.f32.mrb[30].mxu1 }
 0x443   : > { %v2830_v25 = vadd.f32 %v2824_v24, %v2670_v22  ;;  %v6544_v26 = vpop.f32.mrb[31].mxu1  ;;  %v6335_v22 = vld [vmem:[%s7581_s1 + $0x98] sm:$0xff] }
 0x44b   : > { %v2984_v30 = vpop.f32.mrb[32].mxu1 }
 0x44c   : > { %v2990_v33 = vadd.f32 %v2984_v30, %v2830_v25  ;;  %v6549_v34 = vpop.f32.mrb[33].mxu1 }
 0x44f   : > { %v3144_v35 = vpop.f32.mrb[34].mxu1 }
 0x450   : > { %v3150_v36 = vadd.f32 %v3144_v35, %v2990_v33  ;;  %v6554_v38 = vpop.f32.mrb[35].mxu1  ;;  %v6334_v33 = vld [vmem:[%s7581_s1 + $0x90] sm:$0xff] }
 0x452   : > { %v3160_v40 = vadd.f32 %v3156_v39, %v3150_v36 }
 0x454   : > { %v3163_v44 = vmul.f32 %v3160_v40, %v7082_v28 }
 0x456   : > { %v3171_v49 = vmul.f32 %v3163_v44, %v3163_v44  ;;  %v3165_v52 = vsel %vm1670_vm11, %v3163_v44, 0.0 }
 0x458   : > { %v3173_v55 = vsel %vm1670_vm11, %v3171_v49, 0.0 }
 0x468   : > { %v3073_v41 = vpop.f32.mrb[2].mxu0 }
 0x469   : > { %v3158_v42 = vadd.f32 %v3156_v39, %v3073_v41  ;;  %v3075_v43 = vpop.f32.mrb[3].mxu0 }
 0x46a   : > { %v3159_v45 = vadd.f32 %v3156_v39, %v3075_v43  ;;  %v6340_v39 = vld [vmem:[%s7581_s1 + $0xa0] sm:$0xff]  ;;  %v6343_v43 = vld [vmem:[%s7581_s1 + $0xa8] sm:$0xff] }
 0x46b   : > { %v3161_v46 = vmul.f32 %v3158_v42, %v7084_v29 }
 0x46c   : > { %v3162_v47 = vmul.f32 %v3159_v45, %v7086_v32 }
 0x46d   : > { %v3169_v48 = vmul.f32 %v3161_v46, %v3161_v46 }
 0x46e   : > { %v3170_v50 = vmul.f32 %v3162_v47, %v3162_v47  ;;  %v3164_v51 = vadd.f32 %v3162_v47, %v3161_v46  ;;  %v6346_v47 = vld [vmem:[%s7581_s1 + $0xb0] sm:$0xff] }
 0x470   : > { %v3166_v53 = vadd.f32 %v3165_v52, %v3164_v51  ;;  %v3172_v54 = vadd.f32 %v3170_v50, %v3169_v48  ;;  %v6349_v52 = vld [vmem:[%s7581_s1 + $0xb8] sm:$0xff] }
 0x472   : > { %3167 = vadd.xlane.f32.xlu0 %v3166_v53  ;;  %v3174_v56 = vadd.f32 %v3173_v55, %v3172_v54  ;;  %v6352_v55 = vld [vmem:[%s7581_s1 + $0xc0] sm:$0xff] }
 0x474   : > { %3175 = vadd.xlane.f32.xlu1 %v3174_v56 }
 0x4ff   : > { %v3168_v57 = vpop.xlane.xlu0 %3167 }
 0x500   : > { %v3177_v58 = vmul.f32 0.00390625, %v3168_v57 }
 0x501   : > { %v3176_v59 = vpop.xlane.xlu1 %3175 }
 0x502   : > { %v3178_v60 = vmul.f32 0.00390625, %v3176_v59  ;;  %v3179_v61 = vmul.f32 %v3177_v58, %v3177_v58  ;;  %v3182_v2 = vsub.f32 %v3158_v42, %v3177_v58  ;;  %v3183_v3 = vsub.f32 %v3159_v45, %v3177_v58 }
 0x503   : > { %v3184_v4 = vsub.f32 %v3160_v40, %v3177_v58 }
 0x504   : > { %v3180_v62 = vsub.f32 %v3178_v60, %v3179_v61 }
 0x506   : > { %v3181_v63 = vmax.f32 %v3180_v62, 0.0  ;;  %v6355_v62 = vld [vmem:[%s7581_s1 + $0xc8] sm:$0xff] }
 0x508   : > { %v3185_v1 = vadd.f32 1e-05, %v3181_v63 }
 0x50a   : > { %6767 = vrsqrt.f32 %v3185_v1 }
 0x514   : > { %v6768_v5 = vpop.eup %6767 }
 0x515   : > { %v3188_v6 = vmul.f32 %v6768_v5, %v3183_v3  ;;  %v3187_v7 = vmul.f32 %v6768_v5, %v3182_v2  ;;  %v3189_v8 = vmul.f32 %v6768_v5, %v3184_v4  ;;  %v6358_v4 = vld [vmem:[%s7581_s1 + $0xd0] sm:$0xff] }
 0x517   : > { %v3191_v9 = vadd.f32 %v3188_v6, %v7019_v31  ;;  %v3190_v10 = vadd.f32 %v3187_v7, %v7035_v37  ;;  %v3192_v13 = vadd.f32 %v3189_v8, %v7006_v27 }
 0x519   : > { %v3194_v11 = vmul.f32 %v3191_v9, %v7086_v32  ;;  %v3193_v12 = vmul.f32 %v3190_v10, %v7084_v29  ;;  %v3195_v14 = vmul.f32 %v3192_v13, %v7082_v28 }
 0x51b   : > { %3201 = vrot.lane.b32.xlu1 %v3194_v11, %s6848_s27  ;;  %3199 = vrot.lane.b32.xlu0 %v3193_v12, %s6848_s27 }
 0x51f   : > { %3203 = vrot.lane.b32.xlu0 %v3195_v14, %s6848_s27 }
 0x58d   : > { %v3202_v15 = vpop.permute.xlu1 %3201  ;;  %v3200_v16 = vpop.permute.xlu0 %3199 }
 0x58e   : > { %v3205_v31 = vsel %vm1711_vm12, %v3200_v16, %v3202_v15  ;;  %3210 = vst.msk [vmem:[#allocation2] sm:$0xff] %vm1717_vm13, %v3200_v16 }
 0x58f   : > { %3225 = vrot.lane.b32.xlu1 %v3205_v31, %s6838_s6 }
 0x591   : > { %v3204_v37 = vpop.permute.xlu0 %3203 }
 0x592   : > { %v3206_v17 = vsel %vm1711_vm12, %v3202_v15, %v3204_v37 }
 0x593   : > { %3212 = vst.msk [vmem:[#allocation2 + $0x10] sm:$0xff] %vm1720_vm14, %v3206_v17 }
 0x595   : > { %v3213_v27 = vld [vmem:[#allocation2] sm:$0xff] }
 0x596   : > { %3223 = vrot.lane.b32.xlu1 %v3213_v27, %s6838_s6 }
 0x59a   : > { %v3215_v18 = vld [vmem:[#allocation2 + $0x10] sm:$0xff] }
 0x59b   : > { %3227 = vrot.lane.b32.xlu0 %v3215_v18, %s6838_s6  ;;  %3528 = vrot.lane.b32.xlu1 %v3215_v18, %s6840_s7 }
 0x59f   : > { %3526 = vrot.lane.b32.xlu0 %v3205_v31, %s6840_s7  ;;  %3686 = vrot.lane.b32.xlu1 %v3205_v31, %s6841_s8 }
 0x5a3   : > { %3524 = vrot.lane.b32.xlu0 %v3213_v27, %s6840_s7  ;;  %3684 = vrot.lane.b32.xlu1 %v3213_v27, %s6841_s8 }
 0x5a7   : > { %3688 = vrot.lane.b32.xlu0 %v3215_v18, %s6841_s8  ;;  %3848 = vrot.lane.b32.xlu1 %v3215_v18, %s6842_s9 }
 0x5ab   : > { %3846 = vrot.lane.b32.xlu0 %v3205_v31, %s6842_s9  ;;  %4006 = vrot.lane.b32.xlu1 %v3205_v31, %s6843_s10 }
 0x5af   : > { %3844 = vrot.lane.b32.xlu0 %v3213_v27, %s6842_s9  ;;  %4004 = vrot.lane.b32.xlu1 %v3213_v27, %s6843_s10 }
 0x5b3   : > { %4008 = vrot.lane.b32.xlu0 %v3215_v18, %s6843_s10  ;;  %4168 = vrot.lane.b32.xlu1 %v3215_v18, %s6844_s11 }
 0x5b7   : > { %4166 = vrot.lane.b32.xlu0 %v3205_v31, %s6844_s11  ;;  %4326 = vrot.lane.b32.xlu1 %v3205_v31, %s6845_s12 }
 0x5bb   : > { %4164 = vrot.lane.b32.xlu0 %v3213_v27, %s6844_s11  ;;  %4324 = vrot.lane.b32.xlu1 %v3213_v27, %s6845_s12 }
 0x5bf   : > { %4328 = vrot.lane.b32.xlu0 %v3215_v18, %s6845_s12  ;;  %4488 = vrot.lane.b32.xlu1 %v3215_v18, %s6846_s13 }
 0x5c3   : > { %4486 = vrot.lane.b32.xlu0 %v3205_v31, %s6846_s13  ;;  %4646 = vperm.xlu1 %6764, %v6361_v19  }
 0x5c7   : > { %4484 = vrot.lane.b32.xlu0 %v3213_v27, %s6846_s13 }
 0x601   : > { %v3226_v20 = vpop.permute.xlu1 %3225 }
 0x608   : > { %v3224_v21 = vpop.permute.xlu1 %3223 }
 0x609   : > { %v3229_v26 = vsel %vm219_vm2, %v3224_v21, %v3226_v20 }
 0x60d   : > { %v3228_v23 = vpop.permute.xlu0 %3227  ;;  %v3529_v24 = vpop.permute.xlu1 %3528 }
 0x60e   : > { %6556 = vmatpush3.msra.mxu1 %v3228_v23  ;;  %v3230_v25 = vsel %vm219_vm2, %v3226_v20, %v3228_v23 }
 0x60f   : > { %3237 = vmatprep.subr.mxu0 %v3230_v25  ;;  %6558 = vmatmul.mubr.msk.f32.vlgmr.msra.gmra.mrb[36].mxu1 %vm225_vm3, %v6335_v22 }
 0x610   : > { %6560 = vmatprep.subr.mxu1 %v6837_v0  ;;  %3238 = vmatpush1.msra.mxu0 %v3229_v26 }
 0x611   : > { %6561 = vmatpush3.msra.mxu1 %v3215_v18  ;;  %6336 = vmatmul.mubr.msk.f32.vlgmr.msra.gmra.mrb[4].mxu0 %vm225_vm3, %v6335_v22  ;;  %v3527_v30 = vpop.permute.xlu0 %3526  ;;  %v3687_v34 = vpop.permute.xlu1 %3686 }
 0x612   : > { %3381 = vmatprep.subr.mxu0 %v3205_v31  ;;  %6562 = vmatprep.mubr.msk.f32.mxu1 %vm6839_vm1, %v6837_v0  ;;  %v3531_v35 = vsel %vm522_vm4, %v3527_v30, %v3529_v24 }
 0x613   : > { %3382 = vmatpush1.msra.mxu0 %v3213_v27  ;;  %6565 = vmatprep.subr.mxu1 %v6837_v0 }
 0x614   : > { %6563 = vmatmul.mubr.msk.f32.vlgmr.msra.gmra.mrb[38].mxu1 %vm225_vm3, %v6334_v33  ;;  %3538 = vmatprep.subr.mxu0 %v3531_v35 }
 0x615   : > { %6566 = vmatpush3.msra.mxu1 %v3529_v24  ;;  %v3525_v36 = vpop.permute.xlu0 %3524  ;;  %3445 = vmatprep.mubr.f32.mxu0 %v6837_v0  ;;  %v3685_v38 = vpop.permute.xlu1 %3684 }
 0x616   : > { %6567 = vmatprep.mubr.msk.f32.mxu1 %vm6839_vm1, %v6837_v0  ;;  %6570 = vmatprep.subr.mxu1 %v6837_v0  ;;  %v3530_v40 = vsel %vm522_vm4, %v3525_v36, %v3527_v30  ;;  %v3690_v48 = vsel %vm683_vm5, %v3685_v38, %v3687_v34 }
 0x618   : > { %6568 = vmatmul.mubr.msk.f32.vlgmr.msra.gmra.mrb[40].mxu1 %vm225_vm3, %v6340_v39 }
 0x619   : > { %6338 = vmatmul.mubr.msk.f32.vlgmr.msra.gmra.mrb[4].mxu0 %vm225_vm3, %v6334_v33  ;;  %v3689_v41 = vpop.permute.xlu0 %3688  ;;  %v7298_v42 = vpop.permute.xlu1 %3848  ;;  %6572 = vmatprep.mubr.msk.f32.mxu1 %vm6839_vm1, %v6837_v0 }
 0x61a   : > { %3539 = vmatpush1.msra.mxu0 %v3530_v40  ;;  %6571 = vmatpush3.msra.mxu1 %v3689_v41  ;;  %v3691_v44 = vsel %vm683_vm5, %v3687_v34, %v3689_v41 }
 0x61b   : > { %3698 = vmatprep.subr.mxu0 %v3691_v44  ;;  %6575 = vmatprep.subr.mxu1 %v6837_v0 }
 0x61c   : > { %6573 = vmatmul.mubr.msk.f32.vlgmr.msra.gmra.mrb[42].mxu1 %vm225_vm3, %v6343_v43  ;;  %3602 = vmatprep.mubr.f32.mxu0 %v6837_v0 }
 0x61d   : > { %v3847_v45 = vpop.permute.xlu0 %3846  ;;  %6576 = vmatpush3.msra.mxu1 %v7298_v42  ;;  %v4007_v46 = vpop.permute.xlu1 %4006  ;;  %6577 = vmatprep.mubr.msk.f32.mxu1 %vm6839_vm1, %v6837_v0 }
 0x61e   : > { %6580 = vmatprep.subr.mxu1 %v6837_v0  ;;  %v7323_v51 = vsel %vm844_vm6, %v3847_v45, %v7298_v42 }
 0x620   : > { %6578 = vmatmul.mubr.msk.f32.vlgmr.msra.gmra.mrb[44].mxu1 %vm225_vm3, %v6346_v47 }
 0x621   : > { %6341 = vmatmul.mubr.msk.f32.vlgmr.msra.gmra.mrb[4].mxu0 %vm225_vm3, %v6340_v39  ;;  %v3845_v49 = vpop.permute.xlu0 %3844  ;;  %v4005_v50 = vpop.permute.xlu1 %4004  ;;  %6582 = vmatprep.mubr.msk.f32.mxu1 %vm6839_vm1, %v6837_v0 }
 0x622   : > { %3699 = vmatpush1.msra.mxu0 %v3690_v48  ;;  %3762 = vmatprep.mubr.f32.mxu0 %v6837_v0  ;;  %v7338_v56 = vsel %vm844_vm6, %v3845_v49, %v3847_v45  ;;  %v4010_v63 = vsel %vm1005_vm7, %v4005_v50, %v4007_v46 }
 0x623   : > { %3858 = vmatprep.subr.mxu0 %v7323_v51 }
 0x625   : > { %v4009_v53 = vpop.permute.xlu0 %4008  ;;  %v4169_v54 = vpop.permute.xlu1 %4168 }
 0x626   : > { %6581 = vmatpush3.msra.mxu1 %v4009_v53  ;;  %v4011_v59 = vsel %vm1005_vm7, %v4007_v46, %v4009_v53 }
 0x627   : > { %6585 = vmatprep.subr.mxu1 %v6837_v0  ;;  %6583 = vmatmul.mubr.msk.f32.vlgmr.msra.gmra.mrb[46].mxu1 %vm225_vm3, %v6349_v52 }
 0x628   : > { %6586 = vmatpush3.msra.mxu1 %v4169_v54  ;;  %6587 = vmatprep.mubr.msk.f32.mxu1 %vm6839_vm1, %v6837_v0 }
 0x629   : > { %6344 = vmatmul.mubr.msk.f32.vlgmr.msra.gmra.mrb[4].mxu0 %vm225_vm3, %v6343_v43  ;;  %v4167_v57 = vpop.permute.xlu0 %4166  ;;  %v4327_v58 = vpop.permute.xlu1 %4326  ;;  %6590 = vmatprep.subr.mxu1 %v6837_v0 }
 0x62a   : > { %3859 = vmatpush1.msra.mxu0 %v7338_v56  ;;  %3922 = vmatprep.mubr.f32.mxu0 %v6837_v0  ;;  %v4171_v2 = vsel %vm1166_vm8, %v4167_v57, %v4169_v54 }
 0x62b   : > { %4018 = vmatprep.subr.mxu0 %v4011_v59  ;;  %6588 = vmatmul.mubr.msk.f32.vlgmr.msra.gmra.mrb[48].mxu1 %vm225_vm3, %v6352_v55 }
 0x62c   : > { %6592 = vmatprep.mubr.msk.f32.mxu1 %vm6839_vm1, %v6837_v0 }
 0x62d   : > { %v4165_v60 = vpop.permute.xlu0 %4164  ;;  %v4325_v61 = vpop.permute.xlu1 %4324 }
 0x62e   : > { %v4170_v5 = vsel %vm1166_vm8, %v4165_v60, %v4167_v57  ;;  %v4330_v8 = vsel %vm1327_vm9, %v4325_v61, %v4327_v58 }
 0x631   : > { %6347 = vmatmul.mubr.msk.f32.vlgmr.msra.gmra.mrb[4].mxu0 %vm225_vm3, %v6346_v47  ;;  %v4329_v1 = vpop.permute.xlu0 %4328  ;;  %v4489_v3 = vpop.permute.xlu1 %4488 }
 0x632   : > { %4019 = vmatpush1.msra.mxu0 %v4010_v63  ;;  %6591 = vmatpush3.msra.mxu1 %v4329_v1  ;;  %v4331_v6 = vsel %vm1327_vm9, %v4327_v58, %v4329_v1 }
 0x633   : > { %4178 = vmatprep.subr.mxu0 %v4171_v2  ;;  %6593 = vmatmul.mubr.msk.f32.vlgmr.msra.gmra.mrb[50].mxu1 %vm225_vm3, %v6355_v62 }
 0x634   : > { %6595 = vmatprep.subr.mxu1 %v6837_v0  ;;  %6597 = vmatprep.mubr.msk.f32.mxu1 %vm6839_vm1, %v6837_v0 }
 0x635   : > { %6596 = vmatpush3.msra.mxu1 %v4489_v3  ;;  %4082 = vmatprep.mubr.f32.mxu0 %v6837_v0  ;;  %v4487_v7 = vpop.permute.xlu0 %4486 }
 0x636   : > { %6600 = vmatprep.subr.mxu1 %v6837_v0  ;;  %v4491_v9 = vsel %vm1488_vm10, %v4487_v7, %v4489_v3 }
 0x637   : > { %6598 = vmatmul.mubr.msk.f32.vlgmr.msra.gmra.mrb[52].mxu1 %vm225_vm3, %v6358_v4 }
 0x638   : > { %6602 = vmatprep.mubr.msk.f32.mxu1 %vm6839_vm1, %v6837_v0 }
 0x639   : > { %6350 = vmatmul.mubr.msk.f32.vlgmr.msra.gmra.mrb[4].mxu0 %vm225_vm3, %v6349_v52  ;;  %v4485_v10 = vpop.permute.xlu0 %4484 }
 0x63a   : > { %4179 = vmatpush1.msra.mxu0 %v4170_v5  ;;  %4242 = vmatprep.mubr.f32.mxu0 %v6837_v0  ;;  %v4490_v11 = vsel %vm1488_vm10, %v4485_v10, %v4487_v7 }
 0x63b   : > { %4338 = vmatprep.subr.mxu0 %v4331_v6 }
 0x641   : > { %6353 = vmatmul.mubr.msk.f32.vlgmr.msra.gmra.mrb[4].mxu0 %vm225_vm3, %v6352_v55 }
 0x642   : > { %4339 = vmatpush1.msra.mxu0 %v4330_v8  ;;  %4402 = vmatprep.mubr.f32.mxu0 %v6837_v0  ;;  %v4647_v41 = vpop.permute.xlu1 %4646 }
 0x643   : > { %4498 = vmatprep.subr.mxu0 %v4491_v9 }
 0x649   : > { %6356 = vmatmul.mubr.msk.f32.vlgmr.msra.gmra.mrb[4].mxu0 %vm225_vm3, %v6355_v62 }
 0x64a   : > { %4499 = vmatpush1.msra.mxu0 %v4490_v11  ;;  %4562 = vmatprep.mubr.f32.mxu0 %v6837_v0 }
 0x651   : > { %6359 = vmatmul.mubr.msk.f32.vlgmr.msra.gmra.mrb[4].mxu0 %vm225_vm3, %v6358_v4 }
 0x652   : > { %4792 = vmatprep.mubr.f32.mxu0 %v6837_v0 }
 0x6e2   : > { %v3374_v12 = vpop.f32.mrb[36].mxu1 }
 0x6e3   : > { %v6559_v13 = vpop.f32.mrb[37].mxu1 }
 0x6e7   : > { %v3518_v14 = vpop.f32.mrb[38].mxu1 }
 0x6e8   : > { %v3519_v15 = vadd.f32 %v3518_v14, %v3374_v12  ;;  %v6564_v16 = vpop.f32.mrb[39].mxu1 }
 0x6eb   : > { %v3675_v31 = vpop.f32.mrb[40].mxu1 }
 0x6ec   : > { %v3681_v37 = vadd.f32 %v3675_v31, %v3519_v15  ;;  %v6569_v17 = vpop.f32.mrb[41].mxu1 }
 0x6ef   : > { %v3835_v27 = vpop.f32.mrb[42].mxu1 }
 0x6f0   : > { %v3841_v18 = vadd.f32 %v3835_v27, %v3681_v37  ;;  %v6574_v19 = vpop.f32.mrb[43].mxu1 }
 0x6f3   : > { %v3995_v20 = vpop.f32.mrb[44].mxu1 }
 0x6f4   : > { %v4001_v21 = vadd.f32 %v3995_v20, %v3841_v18  ;;  %v6579_v22 = vpop.f32.mrb[45].mxu1 }
 0x6fa   : > { %v4155_v23 = vpop.f32.mrb[46].mxu1 }
 0x6fb   : > { %v4161_v24 = vadd.f32 %v4155_v23, %v4001_v21  ;;  %v6584_v25 = vpop.f32.mrb[47].mxu1 }
 0x6fe   : > { %v4315_v26 = vpop.f32.mrb[48].mxu1 }
 0x6ff   : > { %v4321_v30 = vadd.f32 %v4315_v26, %v4161_v24  ;;  %v6589_v33 = vpop.f32.mrb[49].mxu1  ;;  %v6389_v24 = vld [vmem:[%s7582_s2 + $0x18] sm:$0xff] }
 0x706   : > { %v4475_v34 = vpop.f32.mrb[50].mxu1 }
 0x707   : > { %v4481_v35 = vadd.f32 %v4475_v34, %v4321_v30  ;;  %v6594_v36 = vpop.f32.mrb[51].mxu1  ;;  %v6363_v30 = vld [vmem:[%s7581_s1 + $0xe0] sm:$0xff] }
 0x70a   : > { %v4635_v38 = vpop.f32.mrb[52].mxu1 }
 0x70b   : > { %v4641_v39 = vadd.f32 %v4635_v38, %v4481_v35  ;;  %v6599_v40 = vpop.f32.mrb[53].mxu1 }
 0x70d   : > { %v4651_v43 = vadd.f32 %v4647_v41, %v4641_v39  ;;  %v6362_v39 = vld [vmem:[%s7581_s1 + $0xd8] sm:$0xff] }
 0x70f   : > { %v4654_v47 = vmul.f32 %v4651_v43, %v7082_v28 }
 0x711   : > { %v4662_v53 = vmul.f32 %v4654_v47, %v4654_v47  ;;  %v4656_v57 = vsel %vm1670_vm11, %v4654_v47, 0.0 }
 0x713   : > { %v4664_v60 = vsel %vm1670_vm11, %v4662_v53, 0.0 }
 0x724   : > { %v4564_v44 = vpop.f32.mrb[4].mxu0 }
 0x725   : > { %v4649_v45 = vadd.f32 %v4647_v41, %v4564_v44  ;;  %v4566_v46 = vpop.f32.mrb[5].mxu0 }
 0x726   : > { %v4650_v48 = vadd.f32 %v4647_v41, %v4566_v46 }
 0x727   : > { %v4652_v49 = vmul.f32 %v4649_v45, %v7084_v29 }
 0x728   : > { %v4653_v50 = vmul.f32 %v4650_v48, %v7086_v32 }
 0x729   : > { %v4660_v52 = vmul.f32 %v4652_v49, %v4652_v49 }
 0x72a   : > { %v4661_v54 = vmul.f32 %v4653_v50, %v4653_v50  ;;  %v4655_v55 = vadd.f32 %v4653_v50, %v4652_v49  ;;  %v6371_v49 = vld [vmem:[%s7581_s1 + $0xf0] sm:$0xff] }
 0x72c   : > { %v4657_v58 = vadd.f32 %v4656_v57, %v4655_v55  ;;  %v4663_v59 = vadd.f32 %v4661_v54, %v4660_v52  ;;  %v6374_v54 = vld [vmem:[%s7581_s1 + $0xf8] sm:$0xff] }
 0x72e   : > { %4658 = vadd.xlane.f32.xlu0 %v4657_v58  ;;  %v4665_v61 = vadd.f32 %v4664_v60, %v4663_v59  ;;  %v6377_v60 = vld [vmem:[%s7581_s1 + $0x100] sm:$0xff] }
 0x730   : > { %4666 = vadd.xlane.f32.xlu1 %v4665_v61 }
 0x7bb   : > { %v4659_v62 = vpop.xlane.xlu0 %4658 }
 0x7bc   : > { %v4668_v63 = vmul.f32 0.00390625, %v4659_v62 }
 0x7bd   : > { %v4667_v1 = vpop.xlane.xlu1 %4666 }
 0x7be   : > { %v4669_v2 = vmul.f32 0.00390625, %v4667_v1  ;;  %v4670_v3 = vmul.f32 %v4668_v63, %v4668_v63  ;;  %v4674_v7 = vsub.f32 %v4650_v48, %v4668_v63  ;;  %v4673_v8 = vsub.f32 %v4649_v45, %v4668_v63  ;;  %v6368_v45 = vld [vmem:[%s7581_s1 + $0xe8] sm:$0xff] }
 0x7bf   : > { %v4675_v9 = vsub.f32 %v4651_v43, %v4668_v63  ;;  %v6380_v63 = vld [vmem:[%s7581_s1 + $0x108] sm:$0xff] }
 0x7c0   : > { %v4671_v4 = vsub.f32 %v4669_v2, %v4670_v3 }
 0x7c2   : > { %v4672_v5 = vmax.f32 %v4671_v4, 0.0 }
 0x7c4   : > { %v4676_v6 = vadd.f32 1e-05, %v4672_v5 }
 0x7c6   : > { %6769 = vrsqrt.f32 %v4676_v6 }
 0x7d0   : > { %v6770_v10 = vpop.eup %6769 }
 0x7d1   : > { %v4679_v11 = vmul.f32 %v6770_v10, %v4674_v7  ;;  %v4678_v12 = vmul.f32 %v6770_v10, %v4673_v8  ;;  %v4680_v13 = vmul.f32 %v6770_v10, %v4675_v9  ;;  %v6383_v7 = vld [vmem:[%s7581_s1 + $0x110] sm:$0xff] }
 0x7d3   : > { %v4682_v14 = vmax.f32 %v4679_v11, 0.0  ;;  %v4681_v15 = vmax.f32 %v4678_v12, 0.0  ;;  %v4683_v37 = vmax.f32 %v4680_v13, 0.0  ;;  %v6386_v12 = vld [vmem:[%s7581_s1 + $0x118] sm:$0xff] }
 0x7d5   : > { %v4685_v16 = vmul.f32 %v4682_v14, %v7086_v32  ;;  %v4684_v31 = vmul.f32 %v4681_v15, %v7084_v29  ;;  %v4686_v17 = vmul.f32 %v4683_v37, %v7082_v28 }
 0x7d7   : > { %4692 = vrot.lane.b32.xlu1 %v4685_v16, %s6848_s27  ;;  %4690 = vrot.lane.b32.xlu0 %v4684_v31, %s6848_s27 }
 0x7db   : > { %4694 = vrot.lane.b32.xlu0 %v4686_v17, %s6848_s27 }
 0x849   : > { %v4693_v27 = vpop.permute.xlu1 %4692  ;;  %v4691_v18 = vpop.permute.xlu0 %4690 }
 0x84a   : > { %v4696_v19 = vsel %vm1711_vm12, %v4691_v18, %v4693_v27  ;;  %4701 = vst.msk [vmem:[#allocation2] sm:$0xff] %vm1717_vm13, %v4691_v18 }
 0x84b   : > { %4716 = vrot.lane.b32.xlu1 %v4696_v19, %s6838_s6 }
 0x84d   : > { %v4695_v20 = vpop.permute.xlu0 %4694 }
 0x84e   : > { %v4697_v21 = vsel %vm1711_vm12, %v4693_v27, %v4695_v20 }
 0x84f   : > { %4703 = vst.msk [vmem:[#allocation2 + $0x10] sm:$0xff] %vm1720_vm14, %v4697_v21 }
 0x851   : > { %v4704_v22 = vld [vmem:[#allocation2] sm:$0xff] }
 0x852   : > { %4714 = vrot.lane.b32.xlu1 %v4704_v22, %s6838_s6 }
 0x856   : > { %v4706_v23 = vld [vmem:[#allocation2 + $0x10] sm:$0xff] }
 0x857   : > { %4718 = vrot.lane.b32.xlu0 %v4706_v23, %s6838_s6  ;;  %5019 = vrot.lane.b32.xlu1 %v4706_v23, %s6840_s7 }
 0x85b   : > { %5017 = vrot.lane.b32.xlu0 %v4696_v19, %s6840_s7  ;;  %5177 = vrot.lane.b32.xlu1 %v4696_v19, %s6841_s8 }
 0x85f   : > { %5015 = vrot.lane.b32.xlu0 %v4704_v22, %s6840_s7  ;;  %5175 = vrot.lane.b32.xlu1 %v4704_v22, %s6841_s8 }
 0x863   : > { %5179 = vrot.lane.b32.xlu0 %v4706_v23, %s6841_s8  ;;  %5339 = vrot.lane.b32.xlu1 %v4706_v23, %s6842_s9 }
 0x867   : > { %5337 = vrot.lane.b32.xlu0 %v4696_v19, %s6842_s9  ;;  %5497 = vrot.lane.b32.xlu1 %v4696_v19, %s6843_s10 }
 0x86b   : > { %5335 = vrot.lane.b32.xlu0 %v4704_v22, %s6842_s9  ;;  %5495 = vrot.lane.b32.xlu1 %v4704_v22, %s6843_s10 }
 0x86f   : > { %5499 = vrot.lane.b32.xlu0 %v4706_v23, %s6843_s10  ;;  %5659 = vrot.lane.b32.xlu1 %v4706_v23, %s6844_s11  ;;  %s188_s10 = sand.u32 1, %s6827_s16  }
 0x870   : > { %s6202_s5 = scalar_lea.sflag [#allocation4], %s188_s10 }
 0x873   : > { %5657 = vrot.lane.b32.xlu0 %v4696_v19, %s6844_s11  ;;  %5817 = vrot.lane.b32.xlu1 %v4696_v19, %s6845_s12 }
 0x877   : > { %5655 = vrot.lane.b32.xlu0 %v4704_v22, %s6844_s11  ;;  %5815 = vrot.lane.b32.xlu1 %v4704_v22, %s6845_s12  ;;  %s6709_s11 = smul.u32 24, %s188_s10 }
 0x87b   : > { %5819 = vrot.lane.b32.xlu0 %v4706_v23, %s6845_s12  ;;  %5979 = vrot.lane.b32.xlu1 %v4706_v23, %s6846_s13  ;;  %s190_s12 = scalar_lea.vmem [#allocation3], %s6709_s11 }
 0x87f   : > { %5977 = vrot.lane.b32.xlu0 %v4696_v19, %s6846_s13  ;;  %6137 = vperm.xlu1 %6764, %v6389_v24  }
 0x883   : > { %5975 = vrot.lane.b32.xlu0 %v4704_v22, %s6846_s13  ;;  %s6711_s13 = smul.u32 384, %s6896_s19  ;;  %s6849_s19 = smov [#allocation3]  }
 0x884   : > { %s6777_s20 = sshll.u32 %s6849_s19, 4  ;;  %s6778_s20 = int_to_ptr.vmem [resolvable:$false] %s6777_s20 }
 0x885   : > { %s7537_s30 = scalar_lea.hbm %s7584_s4, %s6711_s13  ;;  %s6779_s22 = scalar_lea.vmem %s6778_s20, 768 }
 0x8bd   : > { %v4717_v25 = vpop.permute.xlu1 %4716 }
 0x8c4   : > { %v4715_v26 = vpop.permute.xlu1 %4714 }
 0x8c5   : > { %v4720_v36 = vsel %vm219_vm2, %v4715_v26, %v4717_v25 }
 0x8c9   : > { %v4719_v33 = vpop.permute.xlu0 %4718  ;;  %v5020_v34 = vpop.permute.xlu1 %5019 }
 0x8ca   : > { %6601 = vmatpush3.msra.mxu1 %v4719_v33  ;;  %v4721_v35 = vsel %vm219_vm2, %v4717_v25, %v4719_v33 }
 0x8cb   : > { %4728 = vmatprep.subr.mxu0 %v4721_v35  ;;  %6603 = vmatmul.mubr.msk.f32.vlgmr.msra.gmra.mrb[54].mxu1 %vm225_vm3, %v6363_v30 }
 0x8cc   : > { %6605 = vmatprep.subr.mxu1 %v6837_v0  ;;  %4729 = vmatpush1.msra.mxu0 %v4720_v36 }
 0x8cd   : > { %6606 = vmatpush3.msra.mxu1 %v4706_v23  ;;  %6364 = vmatmul.mubr.msk.f32.vlgmr.msra.gmra.mrb[6].mxu0 %vm225_vm3, %v6363_v30  ;;  %v5018_v38 = vpop.permute.xlu0 %5017  ;;  %v5178_v40 = vpop.permute.xlu1 %5177 }
 0x8ce   : > { %4872 = vmatprep.subr.mxu0 %v4696_v19  ;;  %6607 = vmatprep.mubr.msk.f32.mxu1 %vm6839_vm1, %v6837_v0  ;;  %v5022_v41 = vsel %vm522_vm4, %v5018_v38, %v5020_v34 }
 0x8cf   : > { %4873 = vmatpush1.msra.mxu0 %v4704_v22  ;;  %6610 = vmatprep.subr.mxu1 %v6837_v0 }
 0x8d0   : > { %6608 = vmatmul.mubr.msk.f32.vlgmr.msra.gmra.mrb[56].mxu1 %vm225_vm3, %v6362_v39  ;;  %5029 = vmatprep.subr.mxu0 %v5022_v41 }
 0x8d1   : > { %6611 = vmatpush3.msra.mxu1 %v5020_v34  ;;  %v5016_v43 = vpop.permute.xlu0 %5015  ;;  %4936 = vmatprep.mubr.f32.mxu0 %v6837_v0  ;;  %v5176_v44 = vpop.permute.xlu1 %5175 }
 0x8d2   : > { %6612 = vmatprep.mubr.msk.f32.mxu1 %vm6839_vm1, %v6837_v0  ;;  %6615 = vmatprep.subr.mxu1 %v6837_v0  ;;  %v5021_v46 = vsel %vm522_vm4, %v5016_v43, %v5018_v38  ;;  %v5181_v55 = vsel %vm683_vm5, %v5176_v44, %v5178_v40 }
 0x8d4   : > { %6613 = vmatmul.mubr.msk.f32.vlgmr.msra.gmra.mrb[58].mxu1 %vm225_vm3, %v6368_v45 }
 0x8d5   : > { %6366 = vmatmul.mubr.msk.f32.vlgmr.msra.gmra.mrb[6].mxu0 %vm225_vm3, %v6362_v39  ;;  %v5180_v47 = vpop.permute.xlu0 %5179  ;;  %v5340_v48 = vpop.permute.xlu1 %5339  ;;  %6617 = vmatprep.mubr.msk.f32.mxu1 %vm6839_vm1, %v6837_v0 }
 0x8d6   : > { %5030 = vmatpush1.msra.mxu0 %v5021_v46  ;;  %6616 = vmatpush3.msra.mxu1 %v5180_v47  ;;  %v5182_v50 = vsel %vm683_vm5, %v5178_v40, %v5180_v47 }
 0x8d7   : > { %5189 = vmatprep.subr.mxu0 %v5182_v50  ;;  %6620 = vmatprep.subr.mxu1 %v6837_v0 }
 0x8d8   : > { %6618 = vmatmul.mubr.msk.f32.vlgmr.msra.gmra.mrb[60].mxu1 %vm225_vm3, %v6371_v49  ;;  %5093 = vmatprep.mubr.f32.mxu0 %v6837_v0 }
 0x8d9   : > { %v5338_v52 = vpop.permute.xlu0 %5337  ;;  %6621 = vmatpush3.msra.mxu1 %v5340_v48  ;;  %v5498_v53 = vpop.permute.xlu1 %5497  ;;  %6622 = vmatprep.mubr.msk.f32.mxu1 %vm6839_vm1, %v6837_v0 }
 0x8da   : > { %6625 = vmatprep.subr.mxu1 %v6837_v0  ;;  %v5342_v59 = vsel %vm844_vm6, %v5338_v52, %v5340_v48 }
 0x8dc   : > { %6623 = vmatmul.mubr.msk.f32.vlgmr.msra.gmra.mrb[62].mxu1 %vm225_vm3, %v6374_v54 }
 0x8dd   : > { %6369 = vmatmul.mubr.msk.f32.vlgmr.msra.gmra.mrb[6].mxu0 %vm225_vm3, %v6368_v45  ;;  %v5336_v57 = vpop.permute.xlu0 %5335  ;;  %v5496_v58 = vpop.permute.xlu1 %5495  ;;  %6627 = vmatprep.mubr.msk.f32.mxu1 %vm6839_vm1, %v6837_v0 }
 0x8de   : > { %5190 = vmatpush1.msra.mxu0 %v5181_v55  ;;  %5253 = vmatprep.mubr.f32.mxu0 %v6837_v0  ;;  %v5341_v1 = vsel %vm844_vm6, %v5336_v57, %v5338_v52  ;;  %v5501_v8 = vsel %vm1005_vm7, %v5496_v58, %v5498_v53 }
 0x8df   : > { %5349 = vmatprep.subr.mxu0 %v5342_v59 }
 0x8e1   : > { %v5500_v61 = vpop.permute.xlu0 %5499  ;;  %v5660_v62 = vpop.permute.xlu1 %5659 }
 0x8e2   : > { %6626 = vmatpush3.msra.mxu1 %v5500_v61  ;;  %v5502_v4 = vsel %vm1005_vm7, %v5498_v53, %v5500_v61 }
 0x8e3   : > { %6630 = vmatprep.subr.mxu1 %v6837_v0  ;;  %6628 = vmatmul.mubr.msk.f32.vlgmr.msra.gmra.mrb[64].mxu1 %vm225_vm3, %v6377_v60 }
 0x8e4   : > { %6631 = vmatpush3.msra.mxu1 %v5660_v62  ;;  %6632 = vmatprep.mubr.msk.f32.mxu1 %vm6839_vm1, %v6837_v0 }
 0x8e5   : > { %6372 = vmatmul.mubr.msk.f32.vlgmr.msra.gmra.mrb[6].mxu0 %vm225_vm3, %v6371_v49  ;;  %v5658_v2 = vpop.permute.xlu0 %5657  ;;  %v5818_v3 = vpop.permute.xlu1 %5817  ;;  %6635 = vmatprep.subr.mxu1 %v6837_v0 }
 0x8e6   : > { %5350 = vmatpush1.msra.mxu0 %v5341_v1  ;;  %5413 = vmatprep.mubr.f32.mxu0 %v6837_v0  ;;  %v5662_v10 = vsel %vm1166_vm8, %v5658_v2, %v5660_v62 }
 0x8e7   : > { %5509 = vmatprep.subr.mxu0 %v5502_v4  ;;  %6633 = vmatmul.mubr.msk.f32.vlgmr.msra.gmra.mrb[66].mxu1 %vm225_vm3, %v6380_v63 }
 0x8e8   : > { %6637 = vmatprep.mubr.msk.f32.mxu1 %vm6839_vm1, %v6837_v0 }
 0x8e9   : > { %v5656_v5 = vpop.permute.xlu0 %5655  ;;  %v5816_v6 = vpop.permute.xlu1 %5815 }
 0x8ea   : > { %v5661_v13 = vsel %vm1166_vm8, %v5656_v5, %v5658_v2  ;;  %v5821_v16 = vsel %vm1327_vm9, %v5816_v6, %v5818_v3 }
 0x8ed   : > { %6375 = vmatmul.mubr.msk.f32.vlgmr.msra.gmra.mrb[6].mxu0 %vm225_vm3, %v6374_v54  ;;  %v5820_v9 = vpop.permute.xlu0 %5819  ;;  %v5980_v11 = vpop.permute.xlu1 %5979 }
 0x8ee   : > { %5510 = vmatpush1.msra.mxu0 %v5501_v8  ;;  %6636 = vmatpush3.msra.mxu1 %v5820_v9  ;;  %v5822_v14 = vsel %vm1327_vm9, %v5818_v3, %v5820_v9 }
 0x8ef   : > { %5669 = vmatprep.subr.mxu0 %v5662_v10  ;;  %6638 = vmatmul.mubr.msk.f32.vlgmr.msra.gmra.mrb[68].mxu1 %vm225_vm3, %v6383_v7 }
 0x8f0   : > { %6640 = vmatprep.subr.mxu1 %v6837_v0  ;;  %6642 = vmatprep.mubr.msk.f32.mxu1 %vm6839_vm1, %v6837_v0 }
 0x8f1   : > { %6641 = vmatpush3.msra.mxu1 %v5980_v11  ;;  %5573 = vmatprep.mubr.f32.mxu0 %v6837_v0  ;;  %v5978_v15 = vpop.permute.xlu0 %5977 }
 0x8f2   : > { %v5982_v31 = vsel %vm1488_vm10, %v5978_v15, %v5980_v11 }
 0x8f3   : > { %6643 = vmatmul.mubr.msk.f32.vlgmr.msra.gmra.mrb[70].mxu1 %vm225_vm3, %v6386_v12 }
 0x8f5   : > { %6378 = vmatmul.mubr.msk.f32.vlgmr.msra.gmra.mrb[6].mxu0 %vm225_vm3, %v6377_v60  ;;  %v5976_v37 = vpop.permute.xlu0 %5975 }
 0x8f6   : > { %5670 = vmatpush1.msra.mxu0 %v5661_v13  ;;  %5733 = vmatprep.mubr.f32.mxu0 %v6837_v0  ;;  %v5981_v17 = vsel %vm1488_vm10, %v5976_v37, %v5978_v15 }
 0x8f7   : > { %5829 = vmatprep.subr.mxu0 %v5822_v14 }
 0x8fd   : > { %6381 = vmatmul.mubr.msk.f32.vlgmr.msra.gmra.mrb[6].mxu0 %vm225_vm3, %v6380_v63 }
 0x8fe   : > { %5830 = vmatpush1.msra.mxu0 %v5821_v16  ;;  %5893 = vmatprep.mubr.f32.mxu0 %v6837_v0  ;;  %v6138_v49 = vpop.permute.xlu1 %6137 }
 0x8ff   : > { %5989 = vmatprep.subr.mxu0 %v5982_v31 }
 0x905   : > { %6384 = vmatmul.mubr.msk.f32.vlgmr.msra.gmra.mrb[6].mxu0 %vm225_vm3, %v6383_v7 }
 0x906   : > { %5990 = vmatpush1.msra.mxu0 %v5981_v17  ;;  %6053 = vmatprep.mubr.f32.mxu0 %v6837_v0 }
 0x90d   : > { %6387 = vmatmul.mubr.msk.f32.vlgmr.msra.gmra.mrb[6].mxu0 %vm225_vm3, %v6386_v12 }
 0x99e   : > { %v4865_v27 = vpop.f32.mrb[54].mxu1 }
 0x99f   : > { %v6604_v18 = vpop.f32.mrb[55].mxu1 }
 0x9a3   : > { %v5009_v19 = vpop.f32.mrb[56].mxu1 }
 0x9a4   : > { %v5010_v20 = vadd.f32 %v5009_v19, %v4865_v27  ;;  %v6609_v21 = vpop.f32.mrb[57].mxu1 }
 0x9a7   : > { %v5166_v22 = vpop.f32.mrb[58].mxu1 }
 0x9a8   : > { %v5172_v23 = vadd.f32 %v5166_v22, %v5010_v20  ;;  %v6614_v24 = vpop.f32.mrb[59].mxu1 }
 0x9ab   : > { %v5326_v25 = vpop.f32.mrb[60].mxu1 }
 0x9ac   : > { %v5332_v26 = vadd.f32 %v5326_v25, %v5172_v23  ;;  %v6619_v30 = vpop.f32.mrb[61].mxu1 }
 0x9af   : > { %v5486_v33 = vpop.f32.mrb[62].mxu1 }
 0x9b0   : > { %v5492_v34 = vadd.f32 %v5486_v33, %v5332_v26  ;;  %v6624_v35 = vpop.f32.mrb[63].mxu1 }
 0x9b6   : > { %v5646_v36 = vpop.f32.mrb[64].mxu1 }
 0x9b7   : > { %v5652_v38 = vadd.f32 %v5646_v36, %v5492_v34  ;;  %v6629_v39 = vpop.f32.mrb[65].mxu1 }
 0x9ba   : > { %v5806_v0 = vpop.f32.mrb[66].mxu1 }
 0x9bb   : > { %v5812_v40 = vadd.f32 %v5806_v0, %v5652_v38  ;;  %v6634_v41 = vpop.f32.mrb[67].mxu1 }
 0x9c2   : > { %v5966_v43 = vpop.f32.mrb[68].mxu1 }
 0x9c3   : > { %v5972_v44 = vadd.f32 %v5966_v43, %v5812_v40  ;;  %v6639_v45 = vpop.f32.mrb[69].mxu1 }
 0x9c6   : > { %v6126_v46 = vpop.f32.mrb[70].mxu1 }
 0x9c7   : > { %v6132_v47 = vadd.f32 %v6126_v46, %v5972_v44  ;;  %v6644_v48 = vpop.f32.mrb[71].mxu1 }
 0x9c9   : > { %v6142_v50 = vadd.f32 %v6138_v49, %v6132_v47 }
 0x9cb   : > { %v6145_v53 = vmul.f32 %v6142_v50, %v7082_v28 }
 0x9cd   : > { %v6153_v60 = vmul.f32 %v6145_v53, %v6145_v53  ;;  %v6147_v1 = vsel %vm1670_vm11, %v6145_v53, 0.0 }
 0x9cf   : > { %v6155_v4 = vsel %vm1670_vm11, %v6153_v60, 0.0 }
 0x9e0   : > { %v6055_v52 = vpop.f32.mrb[6].mxu0 }
 0x9e1   : > { %v6140_v54 = vadd.f32 %v6138_v49, %v6055_v52  ;;  %v6057_v55 = vpop.f32.mrb[7].mxu0 }
 0x9e2   : > { %v6141_v57 = vadd.f32 %v6138_v49, %v6057_v55 }
 0x9e3   : > { %v6143_v58 = vmul.f32 %v6140_v54, %v7084_v29 }
 0x9e4   : > { %v6144_v59 = vmul.f32 %v6141_v57, %v7086_v32 }
 0x9e5   : > { %v6151_v61 = vmul.f32 %v6143_v58, %v6143_v58 }
 0x9e6   : > { %v6146_v62 = vadd.f32 %v6144_v59, %v6143_v58  ;;  %v6152_v63 = vmul.f32 %v6144_v59, %v6144_v59 }
 0x9e8   : > { %v6148_v2 = vadd.f32 %v6147_v1, %v6146_v62  ;;  %v6154_v3 = vadd.f32 %v6152_v63, %v6151_v61 }
 0x9ea   : > { %6149 = vadd.xlane.f32.xlu0 %v6148_v2  ;;  %v6156_v5 = vadd.f32 %v6155_v4, %v6154_v3 }
 0x9ec   : > { %6157 = vadd.xlane.f32.xlu1 %v6156_v5 }
 0xa77   : > { %v6150_v6 = vpop.xlane.xlu0 %6149 }
 0xa78   : > { %v6159_v7 = vmul.f32 0.00390625, %v6150_v6 }
 0xa79   : > { %v6158_v8 = vpop.xlane.xlu1 %6157 }
 0xa7a   : > { %v6160_v9 = vmul.f32 0.00390625, %v6158_v8  ;;  %v6161_v10 = vmul.f32 %v6159_v7, %v6159_v7  ;;  %v6164_v14 = vsub.f32 %v6140_v54, %v6159_v7  ;;  %v6165_v15 = vsub.f32 %v6141_v57, %v6159_v7 }
 0xa7b   : > { %v6166_v16 = vsub.f32 %v6142_v50, %v6159_v7 }
 0xa7c   : > { %v6162_v11 = vsub.f32 %v6160_v9, %v6161_v10 }
 0xa7e   : > { %v6163_v12 = vmax.f32 %v6162_v11, 0.0 }
 0xa80   : > { %v6167_v13 = vadd.f32 1e-05, %v6163_v12 }
 0xa82   : > { %6771 = vrsqrt.f32 %v6167_v13 }
 0xa8c   : > { %v6772_v31 = vpop.eup %6771 }
 0xa8d   : > { %v6170_v37 = vmul.f32 %v6772_v31, %v6165_v15  ;;  %v6169_v17 = vmul.f32 %v6772_v31, %v6164_v14  ;;  %v6171_v27 = vmul.f32 %v6772_v31, %v6166_v16 }
 0xa8f   : > { %v6173_v18 = vadd.f32 %v6170_v37, %v7323_v51  ;;  %v6172_v19 = vadd.f32 %v6169_v17, %v7338_v56  ;;  %v6174_v22 = vadd.f32 %v6171_v27, %v7298_v42 }
 0xa91   : > { %v6176_v20 = vmul.f32 %v6173_v18, %v7086_v32  ;;  %v6175_v21 = vmul.f32 %v6172_v19, %v7084_v29  ;;  %v6177_v23 = vmul.f32 %v6174_v22, %v7082_v28 }
 0xa93   : > { %6183 = vrot.lane.b32.xlu1 %v6176_v20, %s6848_s27  ;;  %6181 = vrot.lane.b32.xlu0 %v6175_v21, %s6848_s27 }
 0xa97   : > { %6185 = vrot.lane.b32.xlu0 %v6177_v23, %s6848_s27  ;;  %s6216_s27 = sshll.u32 %s190_s12, 4  ;;  %s7539_s27 = int_to_ptr.vmem [resolvable:$true] %s6216_s27 }
 0xa98   : > { %s6773_s14 = scalar_lea.vmem %s7539_s27, 384  ;;  %p6780_p0 = scmp.lt.s32.totalorder %s7539_s27, %s6778_s20 }
 0xa99   : > { %p6774_p11 = scmp.ne.s32.totalorder %s7539_s27, %s6773_s14  ;;  %p6781_p1 = scmp.lt.s32.totalorder %s6779_s22, %s6773_s14 }
 0xa9b   : > { %p6775_p12 = pnand %p6774_p11, %p6913_p5  ;;  %p6782_p2 = por %p6781_p1, %p6780_p0 }
 0xa9d   : > { %p6776_p13 = pneg %p6775_p12 }
 0xa9f   : > { %p6783_p3 = pnand %p6782_p2, %p6776_p13 }
 0xb05   : > { %v6184_v51 = vpop.permute.xlu1 %6183  ;;  %v6182_v24 = vpop.permute.xlu0 %6181 }
 0xb06   : > { %v6187_v56 = vsel %vm1711_vm12, %v6182_v24, %v6184_v51  ;;  %6192 = vst.msk [vmem:[#allocation2] sm:$0xff] %vm1717_vm13, %v6182_v24 }
 0xb07   : > { %6199 = vst [vmem:[%s190_s12 + $0x8] sm:$0xff] %v6187_v56 }
 0xb09   : > { %v6186_v29 = vpop.permute.xlu0 %6185 }
 0xb0a   : > { %v6188_v32 = vsel %vm1711_vm12, %v6184_v51, %v6186_v29 }
 0xb0b   : > { %6194 = vst.msk [vmem:[#allocation2 + $0x10] sm:$0xff] %vm1720_vm14, %v6188_v32 }
 0xb0d   : > { %v6195_v42 = vld [vmem:[#allocation2] sm:$0xff] }
 0xb0e   : > { %6198 = vst [vmem:[%s190_s12] sm:$0xff] %v6195_v42 }
 0xb12   : > { %v6197_v28 = vld [vmem:[#allocation2 + $0x10] sm:$0xff] }
 0xb13   : > { %6200 = vst.msk [vmem:[%s190_s12 + $0x10] sm:$0xff] %vm201_vm0, %v6197_v28 }
 0xb14   : > { %6786 = shalt.err (!%p6783_p3)
}
 0xb15   : > { %s6787_s23 = scalar_lea.hbm %s7537_s30, 384  ;;  %s6791_s8 = scalar_lea.hbm %s7584_s4, 768 }
 0xb16   : > { %p6788_p4 = scmp.ne.s32.totalorder %s7537_s30, %s6787_s23  ;;  %p6792_p9 = scmp.lt.u32.totalorder %s7537_s30, %s7584_s4 }
 0xb17   : > { %p6793_p10 = scmp.lt.u32.totalorder %s6791_s8, %s6787_s23  ;;  %p6795_p12 = scmp.lt.u32.totalorder %s6787_s23, %s7537_s30 }
 0xb18   : > { %p6789_p7 = pnand %p6788_p4, %p6913_p5 }
 0xb19   : > { %p6794_p11 = por %p6793_p10, %p6792_p9 }
 0xb1a   : > { %p6790_p8 = pneg %p6789_p7 }
 0xb1b   : > { %p6796_p13 = por %p6795_p12, %p6794_p11 }
 0xb1d   : > { %p6797_p0 = pnand %p6796_p13, %p6790_p8 }
 0xb1f   : > { %6800 = shalt.err (!%p6797_p0)
}
 0xb20   : > { %6712 = dma.vmem_to_hbm [thread:$0]  (%p6913_p5), %s7539_s27, 384, %s7537_s30, %s6202_s5  }
 0xb21 PF: > { %p6718_p1 = scmp.ge.s32.totalorder %s6835_s18, 2  ;;  %s6228_s11 = sand.u32 1, %s6823_s15  }
 0xb22   : > { %s6229_s12 = scalar_lea.sflag [#allocation4], %s6228_s11 }
 0xb23   : > { %p6715_p2 = pnand %p6718_p1, %p6917_p6 }
 0xb25   : > { %6818 = dma.done.wait (!%p6715_p2), %s6229_s12, 384  }
 0xb26   : > { %6820 = vsyncadd (!%p6715_p2), %s6229_s12, 4294966912  ;;  %p14_p3 = scmp.ge.s32.totalorder %s6900_s21, 4   ;;  %s7587_s15 = smov %s6827_s16 }
 0xb27   : > { %s7588_s16 = smov %s6831_s17  ;;  %s7589_s17 = smov %s6911_s24 }
 0xb28   : > { %s7590_s18 = smov %s6900_s21  ;;  %16 = sbr.rel (!%p14_p3) target bundleno = 3 (0x3), region = 109 }
 0xb2f   :  { %6234 = vsyncpa [#allocation4], 1 }
 0xb30   :  { %6236 = vsyncpa [#allocation4 + $0x1], 1 }

</bundles_post_ra>
